<compile_context>
chip_gen: v6e
topology: v6e:2x2x1
jax: 0.10.0
libtpu: 0.0.40
codegen_flags: <defaults>
</compile_context>

<pallas_src>
import functools

import jax
import jax.numpy as jnp
from jax.experimental import pallas as pl
from jax.experimental.pallas import tpu as pltpu

_BN_EPS = 1e-5
_HEAD_NAMES = ("Trimap", "CAM", "BBox", "SAM")


def _round_up(x, k):
    return (x + k - 1) // k * k


@functools.lru_cache(maxsize=None)
def _vmem_cap():
    """3/4 of the device's physical VMEM (conservative fallback if unknown)."""
    try:
        phys = int(pltpu.get_tpu_info().vmem_capacity_bytes)
    except Exception:
        phys = 64 << 20                       # v7x-sized fallback
    return max(16 << 20, (phys * 3) // 4)


@functools.lru_cache(maxsize=None)
def _mxu_lanes():
    """Preferred output-tile width: 256 on v6e/v7x-class MXUs, 128 on v5/older."""
    try:
        kind = jax.devices()[0].device_kind.lower()
        for tag in ("v2", "v3", "v4", "v5"):
            if tag in kind:
                return 128
    except Exception:
        pass
    return 256


def _pick_tn(cout):
    pref = _mxu_lanes()
    if cout % pref == 0:
        return pref
    if cout % 128 == 0:
        return 128
    return cout


def _out_bytes(dtype):
    return 2 if dtype == jnp.bfloat16 else 4


# ----------------------------------------------------------------------------
# Kernel 1 (fallback path): sum_i (TM,K_i)@(K_i,TN) with fused epilogue
#   y = acc*s1 + h1 ; [y += residual] ; [ReLU] ; [y = y*s2 + h2]
# ----------------------------------------------------------------------------
def _matmul_epilogue_kernel(n_in, relu, has_res, has_aff2, *refs):
    idx = 0
    a_refs = refs[idx:idx + n_in]; idx += n_in
    b_refs = refs[idx:idx + n_in]; idx += n_in
    r_ref = None
    if has_res:
        r_ref = refs[idx]; idx += 1
    s1_ref, h1_ref = refs[idx], refs[idx + 1]; idx += 2
    if has_aff2:
        s2_ref, h2_ref = refs[idx], refs[idx + 1]; idx += 2
    o_ref = refs[idx]

    acc = jnp.dot(a_refs[0][...], b_refs[0][...], preferred_element_type=jnp.float32)
    for i in range(1, n_in):
        acc = acc + jnp.dot(a_refs[i][...], b_refs[i][...],
                            preferred_element_type=jnp.float32)
    y = acc * s1_ref[...] + h1_ref[...]
    if has_res:
        y = y + r_ref[...].astype(jnp.float32)
    if relu:
        y = jnp.maximum(y, 0.0)
    if has_aff2:
        y = y * s2_ref[...] + h2_ref[...]
    o_ref[...] = y.astype(o_ref.dtype)


# ----------------------------------------------------------------------------
# Kernel 2 (hot path): implicit-GEMM stride-1 "same" conv.
# The whole padded input (N*Hp, Wp, Cin) is VMEM-resident (constant index map);
# per grid step we compute TR output rows x full width with kh*kw tap matmuls.
# ----------------------------------------------------------------------------
def _implicit_conv_kernel(n_in, kh, kw, wout, tr, tiles_per_img, hp,
                          relu, has_res, has_aff2, *refs):
    idx = 0
    x_refs = refs[idx:idx + n_in]; idx += n_in
    w_refs = refs[idx:idx + n_in]; idx += n_in
    r_ref = None
    if has_res:
        r_ref = refs[idx]; idx += 1
    s1_ref, h1_ref = refs[idx], refs[idx + 1]; idx += 2
    if has_aff2:
        s2_ref, h2_ref = refs[idx], refs[idx + 1]; idx += 2
    o_ref = refs[idx]

    i = pl.program_id(1)                            # row-tile index (fast grid axis)
    img = i // tiles_per_img
    row0 = img * hp + (i % tiles_per_img) * tr      # first padded input row needed

    acc = jnp.zeros((tr * wout, o_ref.shape[-1]), jnp.float32)
    for t in range(n_in):
        x_ref, w_ref = x_refs[t], w_refs[t]
        cin = x_ref.shape[-1]
        for dy in range(kh):
            rows = x_ref[pl.ds(row0 + dy, tr), :, :]          # (tr, Wp, Cin)
            for dx in range(kw):
                a = rows[:, dx:dx + wout, :].reshape(tr * wout, cin)
                acc = acc + jnp.dot(a, w_ref[dy * kw + dx],
                                    preferred_element_type=jnp.float32)
    y = acc * s1_ref[...] + h1_ref[...]
    if has_res:
        y = y + r_ref[...].astype(jnp.float32)
    if relu:
        y = jnp.maximum(y, 0.0)
    if has_aff2:
        y = y * s2_ref[...] + h2_ref[...]
    o_ref[...] = y.astype(o_ref.dtype)


# ----------------------------------------------------------------------------
# Host-side helpers
# ----------------------------------------------------------------------------
def _im2col(x, kh, kw, stride, padding, hout, wout):
    """x: (N,H,W,C) -> (N*hout*wout, kh*kw*C), column order (dy, dx, c)."""
    n, _, _, c = x.shape
    xp = jnp.pad(x, ((0, 0), (padding, padding), (padding, padding), (0, 0)))
    cols = []
    for dy in range(kh):
        for dx in range(kw):
            cols.append(xp[:, dy:dy + stride * hout:stride,
                           dx:dx + stride * wout:stride, :])
    a = jnp.concatenate(cols, axis=-1) if len(cols) > 1 else cols[0]
    return a.reshape(n * hout * wout, kh * kw * c)


def _pad_cin(x, w):
    """Pad Cin (e.g. 3 -> 8) for sublane-aligned layout / cleaner MXU K."""
    cin = x.shape[-1]
    if cin % 8:
        pad = (-cin) % 8
        x = jnp.pad(x, ((0, 0), (0, 0), (0, 0), (0, pad)))
        w = jnp.pad(w, ((0, 0), (0, 0), (0, pad), (0, 0)))
    return x, w


def _pick_tr(h, wout):
    tr = 1
    for cand in (2, 4, 8, 16, 32, 64, 128, 256):
        if cand <= h and h % cand == 0 and cand * wout <= 1024:
            tr = cand
    return tr


def _pick_tm(m, per_row_bytes, budget):
    m8 = _round_up(m, 8)
    cands = (1024, 512, 256, 128, 64, 32, 16, 8)
    for tm in cands:                       # prefer an exact divisor (no M padding)
        if tm <= m8 and m8 % tm == 0 and tm * per_row_bytes <= budget:
            return tm, m8
    for tm in cands:                       # otherwise pad M up to a tile multiple
        if tm <= m8 and tm * per_row_bytes <= budget:
            return tm, _round_up(m, tm)
    return 8, m8


def _implicit_need_bytes(xs, ws, padding, tr, wout, tn, has_res, has_aff2, out_bytes):
    """Conservative VMEM footprint estimate for the implicit-GEMM path."""
    kh, kw = ws[0].shape[0], ws[0].shape[1]
    tn_pad = _round_up(tn, 128)
    need = 0
    for x, _ in zip(xs, ws):
        n, h, wd, c = x.shape
        cin = _round_up(max(c, 8), 8)
        hp, wp = h + 2 * padding, wd + 2 * padding
        need += 2 * (n * hp) * _round_up(wp, 16) * _round_up(cin, 128) * 2  # resident x
        need += 2 * kh * kw * _round_up(cin, 16) * tn_pad * 2               # weight taps
        need += 4 * tr * _round_up(wp, 16) * _round_up(cin, 128) * 2        # slice temps
    tile = tr * wout * tn_pad
    need += 2 * tile * out_bytes + tile * 4                                 # out bufs + acc
    if has_res:
        need += 2 * tile * 2
    need += 8 * tn_pad * 4
    need += 4 << 20
    return need


# ----------------------------------------------------------------------------
# Conv dispatchers
# ----------------------------------------------------------------------------
def _conv_im2col(xs, ws, stride, padding, scale1, shift1, relu,
                 scale2, shift2, residual, out_dtype):
    n, h, wd, _ = xs[0].shape
    kh, kw, _, cout = ws[0].shape
    hout = (h + 2 * padding - kh) // stride + 1
    wout = (wd + 2 * padding - kw) // stride + 1
    m = n * hout * wout

    a_list, b_list = [], []
    for x, w in zip(xs, ws):
        x, w = _pad_cin(x, w)
        x = x.astype(jnp.bfloat16)
        a_list.append(_im2col(x, kh, kw, stride, padding, hout, wout))
        b_list.append(w.reshape(kh * kw * x.shape[-1], cout).astype(jnp.bfloat16))

    tn = _pick_tn(cout)
    has_res = residual is not None
    has_aff2 = scale2 is not None
    obytes = _out_bytes(out_dtype)
    tn_pad = _round_up(tn, 128)
    k_list = [a.shape[1] for a in a_list]

    cap = _vmem_cap()
    fixed = 2 * sum(_round_up(k, 128) * tn_pad * 2 for k in k_list) \
        + 8 * tn_pad * 4 + (4 << 20)
    per_row = 2 * (sum(_round_up(k, 128) * 2 for k in k_list)
                   + tn_pad * obytes
                   + (tn_pad * 2 if has_res else 0)) + tn_pad * 4
    tm, mpad = _pick_tm(m, per_row, max(cap - fixed, 1 << 20))

    if mpad != m:
        a_list = [jnp.pad(a, ((0, mpad - m), (0, 0))) for a in a_list]

    in_specs, operands = [], []
    for a in a_list:
        in_specs.append(pl.BlockSpec((tm, a.shape[1]), lambda j, i: (i, 0)))
        operands.append(a)
    for b in b_list:
        in_specs.append(pl.BlockSpec((b.shape[0], tn), lambda j, i: (0, j)))
        operands.append(b)
    if has_res:
        r = residual.reshape(m, cout).astype(jnp.bfloat16)
        if mpad != m:
            r = jnp.pad(r, ((0, mpad - m), (0, 0)))     # zero rows -> safe through max()
        in_specs.append(pl.BlockSpec((tm, tn), lambda j, i: (i, j)))
        operands.append(r)
    vec = pl.BlockSpec((1, tn), lambda j, i: (0, j))
    in_specs += [vec, vec]
    operands += [scale1.reshape(1, cout).astype(jnp.float32),
                 shift1.reshape(1, cout).astype(jnp.float32)]
    if has_aff2:
        in_specs += [vec, vec]
        operands += [scale2.reshape(1, cout).astype(jnp.float32),
                     shift2.reshape(1, cout).astype(jnp.float32)]

    vmem_limit = int(min(cap, max(fixed + tm * per_row + (8 << 20), 48 << 20)))
    out = pl.pallas_call(
        functools.partial(_matmul_epilogue_kernel, len(a_list), bool(relu),
                          has_res, has_aff2),
        out_shape=jax.ShapeDtypeStruct((mpad, cout), out_dtype),
        grid_spec=pltpu.PrefetchScalarGridSpec(
            num_scalar_prefetch=0,
            grid=(cout // tn, mpad // tm),   # Cout-outer: weights DMA once per Cout tile
            in_specs=in_specs,
            out_specs=pl.BlockSpec((tm, tn), lambda j, i: (i, j)),
        ),
        compiler_params=pltpu.CompilerParams(
            dimension_semantics=("parallel", "parallel"),
            vmem_limit_bytes=vmem_limit,
        ),
    )(*operands)
    return out[:m].reshape(n, hout, wout, cout)


def _conv_implicit(xs, ws, padding, scale1, shift1, relu,
                   scale2, shift2, residual, out_dtype):
    n, h, wd, _ = xs[0].shape
    kh, kw, _, cout = ws[0].shape
    hp, wp = h + 2 * padding, wd + 2 * padding
    m = n * h * wd

    tr = _pick_tr(h, wd)
    tiles_per_img = h // tr
    tn = _pick_tn(cout)
    has_res = residual is not None
    has_aff2 = scale2 is not None
    obytes = _out_bytes(out_dtype)

    x_ops, w_ops = [], []
    for x, w in zip(xs, ws):
        x, w = _pad_cin(x, w)
        cin = x.shape[-1]
        xpad = jnp.pad(x.astype(jnp.bfloat16),
                       ((0, 0), (padding, padding), (padding, padding), (0, 0)))
        x_ops.append(xpad.reshape(n * hp, wp, cin))
        w_ops.append(w.reshape(kh * kw, cin, cout).astype(jnp.bfloat16))

    in_specs, operands = [], []
    for xo in x_ops:
        in_specs.append(pl.BlockSpec(xo.shape, lambda j, i: (0, 0, 0)))
        operands.append(xo)
    for wo in w_ops:
        in_specs.append(pl.BlockSpec((kh * kw, wo.shape[1], tn),
                                     lambda j, i: (0, 0, j)))
        operands.append(wo)
    if has_res:
        r = residual.reshape(m, cout).astype(jnp.bfloat16)
        in_specs.append(pl.BlockSpec((tr * wd, tn), lambda j, i: (i, j)))
        operands.append(r)
    vec = pl.BlockSpec((1, tn), lambda j, i: (0, j))
    in_specs += [vec, vec]
    operands += [scale1.reshape(1, cout).astype(jnp.float32),
                 shift1.reshape(1, cout).astype(jnp.float32)]
    if has_aff2:
        in_specs += [vec, vec]
        operands += [scale2.reshape(1, cout).astype(jnp.float32),
                     shift2.reshape(1, cout).astype(jnp.float32)]

    need = _implicit_need_bytes(xs, ws, padding, tr, wd, tn, has_res, has_aff2, obytes)
    cap = _vmem_cap()
    vmem_limit = int(min(cap, max(need + (8 << 20), 48 << 20)))

    out = pl.pallas_call(
        functools.partial(_implicit_conv_kernel, len(x_ops), kh, kw, wd, tr,
                          tiles_per_img, hp, bool(relu), has_res, has_aff2),
        out_shape=jax.ShapeDtypeStruct((m, cout), out_dtype),
        grid_spec=pltpu.PrefetchScalarGridSpec(
            num_scalar_prefetch=0,
            grid=(cout // tn, n * tiles_per_img),
            in_specs=in_specs,
            out_specs=pl.BlockSpec((tr * wd, tn), lambda j, i: (i, j)),
        ),
        compiler_params=pltpu.CompilerParams(
            dimension_semantics=("parallel", "parallel"),
            vmem_limit_bytes=vmem_limit,
        ),
    )(*operands)
    return out.reshape(n, h, wd, cout)


def conv2d_pallas(xs, ws, stride, padding, scale1, shift1, relu,
                  scale2=None, shift2=None, residual=None,
                  out_dtype=jnp.bfloat16):
    """Multi-input conv (K split over xs/ws) with fused epilogue.
    Semantically equals conv(concat(xs, -1), concat(ws, axis=2)) -> NHWC out."""
    n, h, wd, _ = xs[0].shape
    kh, kw, _, cout = ws[0].shape
    use_implicit = (stride == 1 and kh == kw and 2 * padding == kh - 1
                    and wd % 16 == 0)
    if use_implicit:
        tr = _pick_tr(h, wd)
        tn = _pick_tn(cout)
        need = _implicit_need_bytes(xs, ws, padding, tr, wd, tn,
                                    residual is not None, scale2 is not None,
                                    _out_bytes(out_dtype))
        use_implicit = need <= _vmem_cap()
    if use_implicit:
        try:
            return _conv_implicit(xs, ws, padding, scale1, shift1, relu,
                                  scale2, shift2, residual, out_dtype)
        except Exception:
            # Defensive: if the implicit-GEMM kernel cannot be lowered on this
            # backend (only observable when running op-by-op), use im2col.
            pass
    return _conv_im2col(xs, ws, stride, padding, scale1, shift1, relu,
                        scale2, shift2, residual, out_dtype)


# ----------------------------------------------------------------------------
# Layer helpers (BN folded into the conv epilogue; inference-mode BN)
# ----------------------------------------------------------------------------
def _bn_affine(bnp):
    s = bnp["gamma"] / jnp.sqrt(bnp["var"] + _BN_EPS)
    return s, bnp["beta"] - bnp["mean"] * s


def conv_bn_act(xs, ws, bias, bnp, stride, padding, relu, residual=None,
                out_dtype=jnp.bfloat16):
    """conv -> BN -> [+residual] -> (ReLU), as one fused epilogue."""
    s, t = _bn_affine(bnp)
    return conv2d_pallas(xs, ws, stride, padding, s, bias * s + t, relu,
                         residual=residual, out_dtype=out_dtype)


def conv_relu_bn(xs, ws, bias, bnp, stride, padding, out_dtype=jnp.bfloat16):
    """conv -> ReLU -> BN (ConvSegHead ordering), fused."""
    s, t = _bn_affine(bnp)
    return conv2d_pallas(xs, ws, stride, padding,
                         jnp.ones_like(bias), bias, True, s, t, out_dtype=out_dtype)


def conv_plain(xs, ws, bias, stride, padding, out_dtype=jnp.bfloat16):
    return conv2d_pallas(xs, ws, stride, padding,
                         jnp.ones_like(bias), bias, False, out_dtype=out_dtype)


def double_conv(xs, p):
    """DoubleConv; list input -> conv1's K dimension is split across the inputs
    (replaces the HBM concat of [x_up, skip] in the decoder stages)."""
    if not isinstance(xs, (list, tuple)):
        xs = [xs]
    w1 = p["conv1"]["w"]
    ws, off = [], 0
    for xi in xs:
        c = xi.shape[-1]
        ws.append(w1[:, :, off:off + c, :])
        off += c
    x = conv_bn_act(list(xs), ws, p["conv1"]["b"], p["bn1"], 1, 1, True)
    x = conv_bn_act([x], [p["conv2"]["w"]], p["conv2"]["b"], p["bn2"], 1, 1, True)
    return x


def basic_block(x, p):
    out = conv_bn_act([x], [p["conv1"]["w"]], p["conv1"]["b"], p["bn1"],
                      p["stride"], 1, True)
    if "down_conv" in p:
        idn = conv_bn_act([x], [p["down_conv"]["w"]], p["down_conv"]["b"],
                          p["down_bn"], p["stride"], 0, False)
    else:
        idn = x
    # conv2 + BN + residual add + ReLU fused into one kernel epilogue.
    return conv_bn_act([out], [p["conv2"]["w"]], p["conv2"]["b"], p["bn2"],
                       1, 1, True, residual=idn)


def layer_forward(x, blocks):
    for b in blocks:
        x = basic_block(x, b)
    return x


def maxpool_3x3_s2_p1(x):
    # TODO(synk): max-pool stays as lax.reduce_window (plain-JAX glue, not the hot path).
    return jax.lax.reduce_window(
        x, jnp.array(-jnp.inf, x.dtype), jax.lax.max,
        window_dimensions=(1, 3, 3, 1), window_strides=(1, 2, 2, 1),
        padding=((0, 0), (1, 1), (1, 1), (0, 0)))


def resize_bilinear_ac(x, out_h, out_w):
    """Bilinear resize, align_corners=True, NHWC (matches F.interpolate). Plain-JAX glue."""
    n, h, w, c = x.shape

    def coords(out_s, in_s):
        if out_s == 1 or in_s == 1:
            src = jnp.zeros((out_s,), jnp.float32)
        else:
            src = jnp.arange(out_s, dtype=jnp.float32) * ((in_s - 1) / (out_s - 1))
        i0 = jnp.clip(jnp.floor(src).astype(jnp.int32), 0, in_s - 1)
        i1 = jnp.clip(i0 + 1, 0, in_s - 1)
        return i0, i1, src - i0.astype(jnp.float32)

    y0, y1, wy = coords(out_h, h)
    x0, x1, wx = coords(out_w, w)
    xf = x.astype(jnp.float32)
    top, bot = xf[:, y0, :, :], xf[:, y1, :, :]
    rows = top * (1.0 - wy)[None, :, None, None] + bot * wy[None, :, None, None]
    left, right = rows[:, :, x0, :], rows[:, :, x1, :]
    out = left * (1.0 - wx)[None, None, :, None] + right * wx[None, None, :, None]
    return out.astype(x.dtype)


def upsample2x(x):
    return resize_bilinear_ac(x, 2 * x.shape[1], 2 * x.shape[2])


# ----------------------------------------------------------------------------
# Forward passes matching the PyTorch modules
# ----------------------------------------------------------------------------
def resnet_unet_forward(p, x):  # x: NHWC f32
    x_original = double_conv([x], p["conv_original_size"])
    x0 = conv_bn_act([x], [p["firstconv"]["w"]], p["firstconv"]["b"],
                     p["firstbn"], 2, 3, True)
    x_conv = x0
    xm = maxpool_3x3_s2_p1(x0)
    x1 = layer_forward(xm, p["encoder1"])
    x2 = layer_forward(x1, p["encoder2"])
    x3 = layer_forward(x2, p["encoder3"])
    x4 = layer_forward(x3, p["encoder4"])

    x = upsample2x(x4)
    x = double_conv([x], p["decoder4"])

    x = upsample2x(x)
    if x.shape[1:3] != x3.shape[1:3]:
        x = resize_bilinear_ac(x, x3.shape[1], x3.shape[2])
    x = double_conv([x, x3], p["decoder3"])

    x = upsample2x(x)
    if x.shape[1:3] != x2.shape[1:3]:
        x = resize_bilinear_ac(x, x2.shape[1], x2.shape[2])
    x = double_conv([x, x2], p["decoder2"])

    x = upsample2x(x)
    if x.shape[1:3] != x1.shape[1:3]:
        x = resize_bilinear_ac(x, x1.shape[1], x1.shape[2])
    x = double_conv([x, x1], p["decoder1"])

    x = upsample2x(x)
    if x.shape[1:3] != x_conv.shape[1:3]:
        x = resize_bilinear_ac(x, x_conv.shape[1], x_conv.shape[2])
    x = double_conv([x, x_conv], p["decoder0"])

    x = upsample2x(x)
    if x.shape[1:3] != x_original.shape[1:3]:
        x = resize_bilinear_ac(x, x_original.shape[1], x_original.shape[2])
    x = double_conv([x, x_original], p["last_conv"])
    return x


def seg_heads_forward(heads, feats):
    """All 4 ConvSegHeads batched & lane-dense: one 5x5 conv padded to 128 output
    channels (+fused ReLU/BN) and one block-diagonal 3x3 conv padded 4->128
    output channels; the 4 real maps are sliced out afterwards."""
    w1 = jnp.concatenate([heads[nm]["conv1"]["w"] for nm in _HEAD_NAMES], axis=-1)
    b1 = jnp.concatenate([heads[nm]["conv1"]["b"] for nm in _HEAD_NAMES], axis=0)
    bn = {k: jnp.concatenate([heads[nm]["bn"][k] for nm in _HEAD_NAMES], axis=0)
          for k in ("gamma", "beta", "mean", "var")}
    pad = 64
    w1 = jnp.pad(w1, ((0, 0), (0, 0), (0, 0), (0, pad)))
    b1 = jnp.pad(b1, ((0, pad),))
    bn = {"gamma": jnp.pad(bn["gamma"], (0, pad), constant_values=1.0),
          "beta": jnp.pad(bn["beta"], (0, pad)),
          "mean": jnp.pad(bn["mean"], (0, pad)),
          "var": jnp.pad(bn["var"], (0, pad), constant_values=1.0)}
    y = conv_relu_bn([feats], [w1], b1, bn, 1, 2)                 # (N,H,W,128) bf16

    w2 = jnp.zeros((3, 3, 128, 128), jnp.float32)
    b2 = jnp.zeros((128,), jnp.float32)
    for hi, nm in enumerate(_HEAD_NAMES):
        w2 = w2.at[:, :, 16 * hi:16 * (hi + 1), hi].set(heads[nm]["conv2"]["w"][:, :, :, 0])
        b2 = b2.at[hi].set(heads[nm]["conv2"]["b"][0])
    z = conv_plain([y], [w2], b2, 1, 1, out_dtype=jnp.float32)    # (N,H,W,128)
    return {nm: z[..., hi:hi + 1] for hi, nm in enumerate(_HEAD_NAMES)}


def custom_unet_forward(params, img_nchw):
    x = jnp.transpose(img_nchw, (0, 2, 3, 1)).astype(jnp.float32)   # NCHW -> NHWC
    feats = resnet_unet_forward(params["feature_extractor"], x)
    head_out = seg_heads_forward(params["seg_heads"], feats)
    return {nm: jnp.transpose(v, (0, 3, 1, 2)) for nm, v in head_out.items()}


# ----------------------------------------------------------------------------
# Deterministic parameter construction (He-normal conv weights, default BN stats)
# ----------------------------------------------------------------------------
class _Init:
    def __init__(self, seed=0):
        self._key = jax.random.PRNGKey(seed)
        self._n = 0

    def next(self):
        self._n += 1
        return jax.random.fold_in(self._key, self._n)


def _conv_params(init, kh, kw, cin, cout, bias):
    fan_in = kh * kw * cin
    std = (2.0 / fan_in) ** 0.5
    w = jax.random.normal(init.next(), (kh, kw, cin, cout), jnp.float32) * std
    if bias:
        bound = 1.0 / (fan_in ** 0.5)
        b = jax.random.uniform(init.next(), (cout,), jnp.float32, -bound, bound)
    else:
        b = jnp.zeros((cout,), jnp.float32)
    return {"w": w, "b": b}


def _bn_params(c):
    return {"gamma": jnp.ones((c,), jnp.float32), "beta": jnp.zeros((c,), jnp.float32),
            "mean": jnp.zeros((c,), jnp.float32), "var": jnp.ones((c,), jnp.float32)}


def build_params(seed=0):
    init = _Init(seed)

    def dconv(cin, cout):
        return {"conv1": _conv_params(init, 3, 3, cin, cout, True), "bn1": _bn_params(cout),
                "conv2": _conv_params(init, 3, 3, cout, cout, True), "bn2": _bn_params(cout)}

    def block(cin, cout, stride):
        b = {"stride": stride,
             "conv1": _conv_params(init, 3, 3, cin, cout, False), "bn1": _bn_params(cout),
             "conv2": _conv_params(init, 3, 3, cout, cout, False), "bn2": _bn_params(cout)}
        if stride != 1 or cin != cout:
            b["down_conv"] = _conv_params(init, 1, 1, cin, cout, False)
            b["down_bn"] = _bn_params(cout)
        return b

    def layer(cin, cout, nblocks, stride):
        return [block(cin, cout, stride)] + [block(cout, cout, 1) for _ in range(nblocks - 1)]

    fe = {
        "firstconv": _conv_params(init, 7, 7, 3, 64, False), "firstbn": _bn_params(64),
        "encoder1": layer(64, 64, 3, 1),
        "encoder2": layer(64, 128, 4, 2),
        "encoder3": layer(128, 256, 6, 2),
        "encoder4": layer(256, 512, 3, 2),
        "decoder4": dconv(512, 256),
        "decoder3": dconv(256 + 256, 128),
        "decoder2": dconv(128 + 128, 64),
        "decoder1": dconv(64 + 64, 64),
        "decoder0": dconv(64 + 64, 64),
        "last_conv": dconv(64 + 64, 64),
        "conv_original_size": dconv(3, 64),
    }

    def head():
        return {"conv1": _conv_params(init, 5, 5, 64, 16, True), "bn": _bn_params(16),
                "conv2": _conv_params(init, 3, 3, 16, 1, True)}

    heads = {nm: head() for nm in _HEAD_NAMES}
    return {"feature_extractor": fe, "seg_heads": heads}


if __name__ == "__main__":
    params = build_params(seed=0)
    img = jax.random.normal(jax.random.PRNGKey(0), (2, 3, 32, 32), jnp.float32)  # NCHW

    def run(im):
        # params closed over (keeps strides as Python ints, weights as constants)
        return custom_unet_forward(params, im)

    try:
        out = jax.block_until_ready(jax.jit(run)(img))
    except Exception:
        # Op-by-op execution: each conv can individually fall back to the
        # (previously validated) im2col kernel if the implicit-GEMM kernel
        # cannot be lowered on this backend.
        out = jax.block_until_ready(run(img))

    assert set(out.keys()) == set(_HEAD_NAMES)
    assert all(v.shape == (2, 1, 32, 32) for v in out.values())
    assert all(bool(jnp.isfinite(v).all()) for v in out.values())
    print("KERNEL_OK")
</pallas_src>

<mosaic_0001>
module attributes {stable_mosaic.version = 11 : i64} {
  func.func @_matmul_epilogue_kernel(%arg0: i32, %arg1: i32, %arg2: memref<1024x72xbf16, #tpu.memory_space<vmem>>, %arg3: memref<72x64xbf16, #tpu.memory_space<vmem>>, %arg4: memref<1x64xf32, #tpu.memory_space<vmem>>, %arg5: memref<1x64xf32, #tpu.memory_space<vmem>>, %arg6: memref<1024x64xbf16, #tpu.memory_space<vmem>>) attributes {dimension_semantics = [#tpu.dimension_semantics<parallel>, #tpu.dimension_semantics<parallel>], iteration_bounds = array<i64: 1, 2>, scalar_prefetch = 0 : i64, scratch_operands = 0 : i64, tpu.core_type = #tpu.core_type<tc>, window_params = [{transform_indices = @transform_0, window_bounds = array<i64: 1024, 72>}, {transform_indices = @transform_1, window_bounds = array<i64: 72, 64>}, {transform_indices = @transform_2, window_bounds = array<i64: 1, 64>}, {transform_indices = @transform_3, window_bounds = array<i64: 1, 64>}, {transform_indices = @transform_4, window_bounds = array<i64: 1024, 64>}]} {
    %c0 = arith.constant 0 : index
    %c0_0 = arith.constant 0 : index
    %0 = vector.load %arg2[%c0, %c0_0] : memref<1024x72xbf16, #tpu.memory_space<vmem>>, vector<1024x72xbf16>
    %c0_1 = arith.constant 0 : index
    %c0_2 = arith.constant 0 : index
    %1 = vector.load %arg3[%c0_1, %c0_2] : memref<72x64xbf16, #tpu.memory_space<vmem>>, vector<72x64xbf16>
    %cst = arith.constant dense<0.000000e+00> : vector<1024x64xf32>
    %2 = tpu.matmul %0, %1, %cst {dimension_numbers = #tpu.dot_dimension_numbers<[1], [0], [0], [1], [0, 0, 1, 1], [], []>} : vector<1024x72xbf16>, vector<72x64xbf16>, vector<1024x64xf32> -> vector<1024x64xf32>
    %c0_3 = arith.constant 0 : index
    %c0_4 = arith.constant 0 : index
    %3 = vector.load %arg4[%c0_3, %c0_4] : memref<1x64xf32, #tpu.memory_space<vmem>>, vector<1x64xf32>
    %4 = vector.broadcast %3 : vector<1x64xf32> to vector<1024x64xf32>
    %5 = arith.mulf %2, %4 : vector<1024x64xf32>
    %c0_5 = arith.constant 0 : index
    %c0_6 = arith.constant 0 : index
    %6 = vector.load %arg5[%c0_5, %c0_6] : memref<1x64xf32, #tpu.memory_space<vmem>>, vector<1x64xf32>
    %7 = vector.broadcast %6 : vector<1x64xf32> to vector<1024x64xf32>
    %8 = arith.addf %5, %7 : vector<1024x64xf32>
    %cst_7 = arith.constant 0.000000e+00 : f32
    %9 = vector.broadcast %cst_7 : f32 to vector<1024x64xf32>
    %10 = arith.maximumf %8, %9 : vector<1024x64xf32>
    %11 = arith.truncf %10 : vector<1024x64xf32> to vector<1024x64xbf16>
    %c0_8 = arith.constant 0 : index
    %c0_9 = arith.constant 0 : index
    %12 = vector.load %arg6[%c0_8, %c0_9] : memref<1024x64xbf16, #tpu.memory_space<vmem>>, vector<1024x64xbf16>
    tpu.vector_store %arg6[%c0_8, %c0_9], %11 {strides = array<i32>} : memref<1024x64xbf16, #tpu.memory_space<vmem>>, vector<1024x64xbf16>,
    return
  }
  func.func @transform_0(%arg0: i32, %arg1: i32) -> (i32, i32) {
    %c0_i32 = arith.constant 0 : i32
    %c0_i32_0 = arith.constant 0 : i32
    return %arg1, %c0_i32 : i32, i32
  }
  func.func @transform_1(%arg0: i32, %arg1: i32) -> (i32, i32) {
    %c0_i32 = arith.constant 0 : i32
    %c0_i32_0 = arith.constant 0 : i32
    return %c0_i32, %arg0 : i32, i32
  }
  func.func @transform_2(%arg0: i32, %arg1: i32) -> (i32, i32) {
    %c0_i32 = arith.constant 0 : i32
    %c0_i32_0 = arith.constant 0 : i32
    return %c0_i32, %arg0 : i32, i32
  }
  func.func @transform_3(%arg0: i32, %arg1: i32) -> (i32, i32) {
    %c0_i32 = arith.constant 0 : i32
    %c0_i32_0 = arith.constant 0 : i32
    return %c0_i32, %arg0 : i32, i32
  }
  func.func @transform_4(%arg0: i32, %arg1: i32) -> (i32, i32) {
    %c0_i32 = arith.constant 0 : i32
    return %arg1, %arg0 : i32, i32
  }
}

</mosaic_0001>

<bundles_post_ra>
// kernel: tpu_custom_call.1
= control target key start
LH: loop header
LB: loop body
LE: loop exit
PB: predicated region body
PF: predicated region fallthrough
CT: control target
= control target key end

     0   :  { %s3414_s15 = smov 0   ;;  %s3416_s16 = smov 0   ;;  %s4133_s0 = inlined_call_operand.vmem [shape: bf16[2048,72], index: 0, kind: input, shape index: {}]   ;;  %s4134_s1 = inlined_call_operand.vmem [shape: bf16[72,64], index: 1, kind: input, shape index: {}]   ;;  %s4135_s2 = inlined_call_operand.vmem [shape: f32[1,64], index: 2, kind: input, shape index: {}]   ;;  %s4136_s3 = inlined_call_operand.vmem [shape: f32[1,64], index: 3, kind: input, shape index: {}]   ;;  %s4137_s4 = inlined_call_operand.vmem [shape: bf16[2048,64], index: 4, kind: output, shape index: {}]  }
   0x1   :  { %s3418_s17 = smov 0  }
   0x2 LB: > { %s23_s18 = sadd.s32 1, %s3383_s16  ;;  %p2653_p0 = scmp.ge.s32.totalorder %s3387_s17, 1  ;;  %s3387_s17 = sphi %s3418_s17, %s14_s17   ;;  %s3383_s16 = sphi %s3416_s16, %s4139_s16   ;;  %s3379_s15 = sphi %s3414_s15, %s4138_s15  }
   0x3   : > { %p24_p1 = scmp.ge.s32.totalorder %s23_s18, 2  ;;  %p202_p2 = scmp.lt.s32.totalorder %s3387_s17, 3 }
   0x5   : > { %s4141_s18 = smov (%p24_p1, %s23_s18), 0  ;;  %p203_p3 = pnand %p2653_p0, %p202_p2 }
   0x6   : > { %s2654_s23 = sshll.u32 (!%p203_p3), %s3379_s15, 7 }
   0x7   : > { %206 = sbr.rel (%p203_p3) target bundleno = 370 (0x172), region = 36  ;;  %p242_p4 = scmp.lt.s32.totalorder (!%p203_p3), %s2654_s23, 255 }
   0xc   : > { %v3294_v0 = vld [vmem:[%s4134_s1 + $0x20] ss:$0 sps:$4 sm:$0xff]   ;;  %vm944_vm0 = vcmask 1043456   ;;  %v3295_v1 = vld [vmem:[%s4134_s1 + $0x18] sm:$0xff]   ;;  %v3296_v3 = vld [vmem:[%s4134_s1 + $0x10] sm:$0xff]   ;;  %s4143_s23 = smov (!%p242_p4, %s2654_s23), 255 }
   0xd   : > { %3268 = vmatprep.subr.msk.bf16.mxu0 %vm944_vm0, %v3294_v0  ;;  %3269 = vmatprep.subr.msk.bf16.mxu1 %vm944_vm0, %v3294_v0  ;;  %v946_v2 = vsel %vm944_vm0, %v3294_v0, 0  ;;  %v3297_v4 = vld [vmem:[%s4134_s1 + $0x8] sm:$0xff]   ;;  %s2655_s28 = sshll.u32 %s4143_s23, 2  ;;  %vm751_vm1 = vcmask 588800   ;;  %v3298_v7 = vld [vmem:[%s4134_s1] sm:$0xff]   ;;  %vm2403_vm2 = vcmask 519168  }
   0xe   : > { %3121 = vmatpush3.bf16.msra.mxu0 %v946_v2  ;;  %3263 = vmatpush3.bf16.msra.mxu1 %v946_v2  ;;  %s3452_s5 = scalar_lea.vmem %s4133_s0, %s2655_s28  ;;  %s3608_s14 = scalar_lea.vmem %s4137_s4, %s2655_s28 }
   0xf   : > { %3122 = vmatprep.subr.bf16.mxu0 %v3295_v1  ;;  %3259 = vmatprep.subr.bf16.mxu1 %v3295_v1  ;;  %v3299_v5 = vld [vmem:[%s3452_s5] sm:$0xff]   ;;  %v3301_v8 = vld [vmem:[%s3452_s5 + $0x8] sm:$0xff]   ;;  %v3303_v10 = vld [vmem:[%s3452_s5 + $0x10] sm:$0xff]  }
  0x10   : > { %v3300_v6 = vld [vmem:[%s3452_s5 + $0x100] sm:$0xff]   ;;  %3130 = vmatprep.mubr.msk.bf16.mxu0 %vm751_vm1, %v3299_v5  ;;  %v3302_v9 = vld [vmem:[%s3452_s5 + $0x108] sm:$0xff]   ;;  %v3304_v11 = vld [vmem:[%s3452_s5 + $0x110] sm:$0xff]  }
  0x11   : > { %3194 = vmatprep.mubr.msk.bf16.mxu1 %vm751_vm1, %v3300_v6  ;;  %v3305_v12 = vld [vmem:[%s3452_s5 + $0x18] sm:$0xff]   ;;  %v3307_v14 = vld [vmem:[%s3452_s5 + $0x20] sm:$0xff]   ;;  %v3309_v16 = vld [vmem:[%s3452_s5 + $0x28] sm:$0xff]  }
  0x12   : > { %3123 = vmatpush3.bf16.msra.mxu0 %v3295_v1  ;;  %3264 = vmatpush3.bf16.msra.mxu1 %v3295_v1  ;;  %v3306_v13 = vld [vmem:[%s3452_s5 + $0x118] sm:$0xff]   ;;  %v3308_v15 = vld [vmem:[%s3452_s5 + $0x120] sm:$0xff]   ;;  %v3310_v17 = vld [vmem:[%s3452_s5 + $0x128] sm:$0xff]  }
  0x13   : > { %3124 = vmatprep.subr.bf16.mxu0 %v3296_v3  ;;  %3260 = vmatprep.subr.bf16.mxu1 %v3296_v3  ;;  %v3311_v18 = vld [vmem:[%s3452_s5 + $0x30] sm:$0xff]   ;;  %v3313_v20 = vld [vmem:[%s3452_s5 + $0x38] sm:$0xff]   ;;  %v3315_v22 = vld [vmem:[%s3452_s5 + $0x40] sm:$0xff]  }
  0x14   : > { %v3312_v19 = vld [vmem:[%s3452_s5 + $0x130] sm:$0xff]   ;;  %v3314_v21 = vld [vmem:[%s3452_s5 + $0x138] sm:$0xff]   ;;  %v3316_v23 = vld [vmem:[%s3452_s5 + $0x140] sm:$0xff]  }
  0x15   : > { %v3317_v24 = vld [vmem:[%s3452_s5 + $0x48] sm:$0xff]   ;;  %v3319_v26 = vld [vmem:[%s3452_s5 + $0x50] sm:$0xff]   ;;  %v3321_v28 = vld [vmem:[%s3452_s5 + $0x58] sm:$0xff]  }
  0x16   : > { %3125 = vmatpush3.bf16.msra.mxu0 %v3296_v3  ;;  %3265 = vmatpush3.bf16.msra.mxu1 %v3296_v3  ;;  %v3318_v25 = vld [vmem:[%s3452_s5 + $0x148] sm:$0xff]   ;;  %v3320_v27 = vld [vmem:[%s3452_s5 + $0x150] sm:$0xff]   ;;  %v3322_v29 = vld [vmem:[%s3452_s5 + $0x158] sm:$0xff]  }
  0x17   : > { %3126 = vmatprep.subr.bf16.mxu0 %v3297_v4  ;;  %3261 = vmatprep.subr.bf16.mxu1 %v3297_v4  ;;  %v3323_v30 = vld [vmem:[%s3452_s5 + $0x60] sm:$0xff]   ;;  %v3325_v32 = vld [vmem:[%s3452_s5 + $0x68] sm:$0xff]   ;;  %v3327_v34 = vld [vmem:[%s3452_s5 + $0x70] sm:$0xff]  }
  0x18   : > { %v3324_v31 = vld [vmem:[%s3452_s5 + $0x160] sm:$0xff]   ;;  %v3326_v33 = vld [vmem:[%s3452_s5 + $0x168] sm:$0xff]   ;;  %v3328_v35 = vld [vmem:[%s3452_s5 + $0x170] sm:$0xff]  }
  0x19   : > { %v3329_v36 = vld [vmem:[%s3452_s5 + $0x78] sm:$0xff]   ;;  %v3331_v38 = vld [vmem:[%s3452_s5 + $0x80] sm:$0xff]   ;;  %v3333_v40 = vld [vmem:[%s3452_s5 + $0x88] sm:$0xff]  }
  0x1a   : > { %3127 = vmatpush3.bf16.msra.mxu0 %v3297_v4  ;;  %3266 = vmatpush3.bf16.msra.mxu1 %v3297_v4  ;;  %v3330_v37 = vld [vmem:[%s3452_s5 + $0x178] sm:$0xff]   ;;  %v3332_v39 = vld [vmem:[%s3452_s5 + $0x180] sm:$0xff]   ;;  %v3334_v41 = vld [vmem:[%s3452_s5 + $0x188] sm:$0xff]  }
  0x1b   : > { %3128 = vmatprep.subr.bf16.mxu0 %v3298_v7  ;;  %3262 = vmatprep.subr.bf16.mxu1 %v3298_v7  ;;  %v3335_v42 = vld [vmem:[%s3452_s5 + $0x90] sm:$0xff]   ;;  %v3337_v44 = vld [vmem:[%s3452_s5 + $0x98] sm:$0xff]   ;;  %v3339_v46 = vld [vmem:[%s3452_s5 + $0xa0] sm:$0xff]  }
  0x1c   : > { %v3336_v43 = vld [vmem:[%s3452_s5 + $0x190] sm:$0xff]   ;;  %v3338_v45 = vld [vmem:[%s3452_s5 + $0x198] sm:$0xff]   ;;  %v3340_v47 = vld [vmem:[%s3452_s5 + $0x1a0] sm:$0xff]  }
  0x1d   : > { %v3341_v48 = vld [vmem:[%s3452_s5 + $0xa8] sm:$0xff]   ;;  %v3343_v50 = vld [vmem:[%s3452_s5 + $0xb0] sm:$0xff]   ;;  %v3345_v52 = vld [vmem:[%s3452_s5 + $0xb8] sm:$0xff]  }
  0x1e   : > { %3129 = vmatpush3.bf16.msra.mxu0 %v3298_v7  ;;  %3267 = vmatpush3.bf16.msra.mxu1 %v3298_v7  ;;  %v3342_v49 = vld [vmem:[%s3452_s5 + $0x1a8] sm:$0xff]   ;;  %v3344_v51 = vld [vmem:[%s3452_s5 + $0x1b0] sm:$0xff]   ;;  %v3346_v53 = vld [vmem:[%s3452_s5 + $0x1b8] sm:$0xff]  }
  0x1f   : > { %v3347_v54 = vld [vmem:[%s3452_s5 + $0xc0] sm:$0xff]   ;;  %v3349_v56 = vld [vmem:[%s3452_s5 + $0xc8] sm:$0xff]   ;;  %v3351_v58 = vld [vmem:[%s3452_s5 + $0xd0] sm:$0xff]  }
  0x20   : > { %v3348_v55 = vld [vmem:[%s3452_s5 + $0x1c0] sm:$0xff]   ;;  %v3350_v57 = vld [vmem:[%s3452_s5 + $0x1c8] sm:$0xff]   ;;  %v3352_v59 = vld [vmem:[%s3452_s5 + $0x1d0] sm:$0xff]  }
  0x21   : > { %3131 = vmatmul.mubr.msk.bf16.vlgmr.msra.gmra.mxu0 %vm751_vm1, %v3301_v8  ;;  %3195 = vmatmul.mubr.msk.bf16.vlgmr.msra.gmra.mxu1 %vm751_vm1, %v3302_v9  ;;  %v3353_v60 = vld [vmem:[%s3452_s5 + $0xd8] sm:$0xff]   ;;  %v3355_v62 = vld [vmem:[%s3452_s5 + $0xe0] sm:$0xff]   ;;  %v3357_v0 = vld [vmem:[%s3452_s5 + $0xe8] sm:$0xff]  }
  0x22   : > { %3134 = vmatprep.mubr.msk.bf16.mxu0 %vm751_vm1, %v3303_v10  ;;  %3198 = vmatprep.mubr.msk.bf16.mxu1 %vm751_vm1, %v3304_v11  ;;  %v3354_v61 = vld [vmem:[%s3452_s5 + $0x1d8] sm:$0xff]   ;;  %v3356_v63 = vld [vmem:[%s3452_s5 + $0x1e0] sm:$0xff]   ;;  %v3358_v1 = vld [vmem:[%s3452_s5 + $0x1e8] sm:$0xff]  }
  0x23   : > { %v3359_v2 = vld [vmem:[%s3452_s5 + $0xf0] sm:$0xff]   ;;  %v3361_v4 = vld [vmem:[%s3452_s5 + $0xf8] sm:$0xff]   ;;  %v3588_v6 = vld [vmem:[%s4135_s2] ss:$0 sm:$0xff] }
  0x24   : > { %v3360_v3 = vld [vmem:[%s3452_s5 + $0x1f0] sm:$0xff]   ;;  %v3362_v5 = vld [vmem:[%s3452_s5 + $0x1f8] sm:$0xff]   ;;  %v3593_v8 = vld [vmem:[%s4136_s3] ss:$0 sm:$0xff] }
  0x29   : > { %3135 = vmatmul.mubr.msk.bf16.gmra.mxu0 %vm751_vm1, %v3305_v12  ;;  %3199 = vmatmul.mubr.msk.bf16.gmra.mxu1 %vm751_vm1, %v3306_v13 }
  0x2a   : > { %3138 = vmatprep.mubr.msk.bf16.mxu0 %vm751_vm1, %v3307_v14  ;;  %3202 = vmatprep.mubr.msk.bf16.mxu1 %vm751_vm1, %v3308_v15 }
  0x31   : > { %3139 = vmatmul.mubr.msk.bf16.gmra.mxu0 %vm751_vm1, %v3309_v16  ;;  %3203 = vmatmul.mubr.msk.bf16.gmra.mxu1 %vm751_vm1, %v3310_v17 }
  0x32   : > { %3142 = vmatprep.mubr.msk.bf16.mxu0 %vm751_vm1, %v3311_v18  ;;  %3206 = vmatprep.mubr.msk.bf16.mxu1 %vm751_vm1, %v3312_v19 }
  0x39   : > { %3143 = vmatmul.mubr.msk.bf16.gmra.mxu0 %vm751_vm1, %v3313_v20  ;;  %3207 = vmatmul.mubr.msk.bf16.gmra.mxu1 %vm751_vm1, %v3314_v21 }
  0x3a   : > { %3146 = vmatprep.mubr.msk.bf16.mxu0 %vm751_vm1, %v3315_v22  ;;  %3210 = vmatprep.mubr.msk.bf16.mxu1 %vm751_vm1, %v3316_v23 }
  0x41   : > { %3147 = vmatmul.mubr.msk.bf16.gmra.mxu0 %vm751_vm1, %v3317_v24  ;;  %3211 = vmatmul.mubr.msk.bf16.gmra.mxu1 %vm751_vm1, %v3318_v25 }
  0x42   : > { %3150 = vmatprep.mubr.msk.bf16.mxu0 %vm751_vm1, %v3319_v26  ;;  %3214 = vmatprep.mubr.msk.bf16.mxu1 %vm751_vm1, %v3320_v27 }
  0x49   : > { %3151 = vmatmul.mubr.msk.bf16.gmra.mxu0 %vm751_vm1, %v3321_v28  ;;  %3215 = vmatmul.mubr.msk.bf16.gmra.mxu1 %vm751_vm1, %v3322_v29 }
  0x4a   : > { %3154 = vmatprep.mubr.msk.bf16.mxu0 %vm751_vm1, %v3323_v30  ;;  %3218 = vmatprep.mubr.msk.bf16.mxu1 %vm751_vm1, %v3324_v31 }
  0x51   : > { %3155 = vmatmul.mubr.msk.bf16.gmra.mxu0 %vm751_vm1, %v3325_v32  ;;  %3219 = vmatmul.mubr.msk.bf16.gmra.mxu1 %vm751_vm1, %v3326_v33 }
  0x52   : > { %3158 = vmatprep.mubr.msk.bf16.mxu0 %vm751_vm1, %v3327_v34  ;;  %3222 = vmatprep.mubr.msk.bf16.mxu1 %vm751_vm1, %v3328_v35 }
  0x59   : > { %3159 = vmatmul.mubr.msk.bf16.gmra.mxu0 %vm751_vm1, %v3329_v36  ;;  %3223 = vmatmul.mubr.msk.bf16.gmra.mxu1 %vm751_vm1, %v3330_v37 }
  0x5a   : > { %3162 = vmatprep.mubr.msk.bf16.mxu0 %vm751_vm1, %v3331_v38  ;;  %3226 = vmatprep.mubr.msk.bf16.mxu1 %vm751_vm1, %v3332_v39 }
  0x61   : > { %3163 = vmatmul.mubr.msk.bf16.gmra.mxu0 %vm751_vm1, %v3333_v40  ;;  %3227 = vmatmul.mubr.msk.bf16.gmra.mxu1 %vm751_vm1, %v3334_v41 }
  0x62   : > { %3166 = vmatprep.mubr.msk.bf16.mxu0 %vm751_vm1, %v3335_v42  ;;  %3230 = vmatprep.mubr.msk.bf16.mxu1 %vm751_vm1, %v3336_v43 }
  0x69   : > { %3167 = vmatmul.mubr.msk.bf16.gmra.mxu0 %vm751_vm1, %v3337_v44  ;;  %3231 = vmatmul.mubr.msk.bf16.gmra.mxu1 %vm751_vm1, %v3338_v45 }
  0x6a   : > { %3170 = vmatprep.mubr.msk.bf16.mxu0 %vm751_vm1, %v3339_v46  ;;  %3234 = vmatprep.mubr.msk.bf16.mxu1 %vm751_vm1, %v3340_v47 }
  0x71   : > { %3171 = vmatmul.mubr.msk.bf16.gmra.mxu0 %vm751_vm1, %v3341_v48  ;;  %3235 = vmatmul.mubr.msk.bf16.gmra.mxu1 %vm751_vm1, %v3342_v49 }
  0x72   : > { %3174 = vmatprep.mubr.msk.bf16.mxu0 %vm751_vm1, %v3343_v50  ;;  %3238 = vmatprep.mubr.msk.bf16.mxu1 %vm751_vm1, %v3344_v51 }
  0x79   : > { %3175 = vmatmul.mubr.msk.bf16.gmra.mxu0 %vm751_vm1, %v3345_v52  ;;  %3239 = vmatmul.mubr.msk.bf16.gmra.mxu1 %vm751_vm1, %v3346_v53 }
  0x7a   : > { %3178 = vmatprep.mubr.msk.bf16.mxu0 %vm751_vm1, %v3347_v54  ;;  %3242 = vmatprep.mubr.msk.bf16.mxu1 %vm751_vm1, %v3348_v55 }
  0x81   : > { %3179 = vmatmul.mubr.msk.bf16.gmra.mxu0 %vm751_vm1, %v3349_v56  ;;  %3243 = vmatmul.mubr.msk.bf16.gmra.mxu1 %vm751_vm1, %v3350_v57 }
  0x82   : > { %3182 = vmatprep.mubr.msk.bf16.mxu0 %vm751_vm1, %v3351_v58  ;;  %3246 = vmatprep.mubr.msk.bf16.mxu1 %vm751_vm1, %v3352_v59 }
  0x89   : > { %3183 = vmatmul.mubr.msk.bf16.gmra.mxu0 %vm751_vm1, %v3353_v60  ;;  %3247 = vmatmul.mubr.msk.bf16.gmra.mxu1 %vm751_vm1, %v3354_v61 }
  0x8a   : > { %3186 = vmatprep.mubr.msk.bf16.mxu0 %vm751_vm1, %v3355_v62  ;;  %3250 = vmatprep.mubr.msk.bf16.mxu1 %vm751_vm1, %v3356_v63 }
  0x91   : > { %3187 = vmatmul.mubr.msk.bf16.gmra.mxu0 %vm751_vm1, %v3357_v0  ;;  %3251 = vmatmul.mubr.msk.bf16.gmra.mxu1 %vm751_vm1, %v3358_v1 }
  0x92   : > { %3190 = vmatprep.mubr.msk.bf16.mxu0 %vm751_vm1, %v3359_v2  ;;  %3254 = vmatprep.mubr.msk.bf16.mxu1 %vm751_vm1, %v3360_v3 }
  0x99   : > { %3191 = vmatmul.mubr.msk.bf16.gmra.mxu0 %vm751_vm1, %v3361_v4  ;;  %3255 = vmatmul.mubr.msk.bf16.gmra.mxu1 %vm751_vm1, %v3362_v5 }
  0xe1   : > { %v3132_v7 = vpop.f32.mrf.mxu0  ;;  %v3196_v9 = vpop.f32.mrf.mxu1 }
  0xe2   : > { %v1502_v10 = vmul.f32 %v3132_v7, %v3588_v6  ;;  %v1566_v11 = vmul.f32 %v3196_v9, %v3588_v6 }
  0xe3   : > { %v982_v12 = vpop.f32.mrf.mxu0  ;;  %v1238_v13 = vpop.f32.mrf.mxu1 }
  0xe4   : > { %v1637_v14 = vadd.f32 %v3593_v8, %v1502_v10  ;;  %v1701_v15 = vadd.f32 %v3593_v8, %v1566_v11  ;;  %v1500_v16 = vmul.f32 %v3588_v6, %v982_v12  ;;  %v1564_v17 = vmul.f32 %v3588_v6, %v1238_v13 }
  0xe5   : > { %v3133_v18 = vpop.f32.mrf.mxu0  ;;  %v3197_v19 = vpop.f32.mrf.mxu1 }
  0xe6   : > { %v1765_v20 = vmax.f32 %v1637_v14, 0.0  ;;  %v1829_v21 = vmax.f32 %v1701_v15, 0.0  ;;  %v1635_v22 = vadd.f32 %v3593_v8, %v1500_v16  ;;  %v1699_v23 = vadd.f32 %v3593_v8, %v1564_v17 }
  0xe7   : > { %v1503_v24 = vmul.f32 %v3133_v18, %v3588_v6  ;;  %v1567_v25 = vmul.f32 %v3197_v19, %v3588_v6  ;;  %v985_v26 = vpop.f32.mrf.mxu0  ;;  %v1241_v27 = vpop.f32.mrf.mxu1 }
  0xe8   : > { %v2925_v28 = vpack.c.bf16 %v1765_v20, %v1765_v20  ;;  %v2989_v29 = vpack.c.bf16 %v1829_v21, %v1829_v21  ;;  %v1763_v30 = vmax.f32 %v1635_v22, 0.0  ;;  %v1827_v31 = vmax.f32 %v1699_v23, 0.0 }
  0xe9   : > { %v1638_v32 = vadd.f32 %v3593_v8, %v1503_v24  ;;  %v1702_v33 = vadd.f32 %v3593_v8, %v1567_v25  ;;  %v1501_v34 = vmul.f32 %v3588_v6, %v985_v26  ;;  %v1565_v35 = vmul.f32 %v3588_v6, %v1241_v27  ;;  %v3136_v36 = vpop.f32.mrf.mxu0  ;;  %v3200_v37 = vpop.f32.mrf.mxu1 }
  0xea   : > { %2406 = vst.msk [vmem:[%s3608_s14 + $0x8] sm:$0xf] %vm2403_vm2, %v2925_v28  ;;  %2470 = vst.msk [vmem:[%s3608_s14 + $0x108] sm:$0xf] %vm2403_vm2, %v2989_v29  ;;  %v2923_v38 = vpack.c.bf16 %v1763_v30, %v1763_v30  ;;  %v2987_v39 = vpack.c.bf16 %v1827_v31, %v1827_v31  ;;  %v1506_v40 = vmul.f32 %v3136_v36, %v3588_v6 }
  0xeb   : > { %v1570_v41 = vmul.f32 %v3200_v37, %v3588_v6  ;;  %v1766_v42 = vmax.f32 %v1638_v32, 0.0  ;;  %v1830_v43 = vmax.f32 %v1702_v33, 0.0  ;;  %v1636_v44 = vadd.f32 %v3593_v8, %v1501_v34  ;;  %v998_v46 = vpop.f32.mrf.mxu0  ;;  %v1254_v47 = vpop.f32.mrf.mxu1 }
  0xec   : > { %v1700_v45 = vadd.f32 %v3593_v8, %v1565_v35  ;;  %2404 = vst.msk [vmem:[%s3608_s14] sm:$0xf] %vm2403_vm2, %v2923_v38  ;;  %2468 = vst.msk [vmem:[%s3608_s14 + $0x100] sm:$0xf] %vm2403_vm2, %v2987_v39  ;;  %v1641_v48 = vadd.f32 %v3593_v8, %v1506_v40  ;;  %v1504_v50 = vmul.f32 %v3588_v6, %v998_v46 }
  0xed   : > { %v1705_v49 = vadd.f32 %v3593_v8, %v1570_v41  ;;  %v1568_v51 = vmul.f32 %v3588_v6, %v1254_v47  ;;  %v2926_v52 = vpack.c.bf16 %v1766_v42, %v1766_v42  ;;  %v2990_v53 = vpack.c.bf16 %v1830_v43, %v1830_v43  ;;  %v3137_v56 = vpop.f32.mrf.mxu0  ;;  %v3201_v57 = vpop.f32.mrf.mxu1 }
  0xee   : > { %v1764_v54 = vmax.f32 %v1636_v44, 0.0  ;;  %v1828_v55 = vmax.f32 %v1700_v45, 0.0  ;;  %v1769_v58 = vmax.f32 %v1641_v48, 0.0  ;;  %v1639_v60 = vadd.f32 %v3593_v8, %v1504_v50 }
  0xef   : > { %v1833_v59 = vmax.f32 %v1705_v49, 0.0  ;;  %v1703_v61 = vadd.f32 %v3593_v8, %v1568_v51  ;;  %2407 = vst.msk [vmem:[%s3608_s14 + $0xc] sm:$0xf] %vm2403_vm2, %v2926_v52  ;;  %2471 = vst.msk [vmem:[%s3608_s14 + $0x10c] sm:$0xf] %vm2403_vm2, %v2990_v53  ;;  %v1507_v0 = vmul.f32 %v3137_v56, %v3588_v6  ;;  %v1571_v1 = vmul.f32 %v3201_v57, %v3588_v6  ;;  %v1001_v2 = vpop.f32.mrf.mxu0  ;;  %v1257_v3 = vpop.f32.mrf.mxu1 }
  0xf0   : > { %v2924_v62 = vpack.c.bf16 %v1764_v54, %v1764_v54  ;;  %v2988_v63 = vpack.c.bf16 %v1828_v55, %v1828_v55  ;;  %v2929_v4 = vpack.c.bf16 %v1769_v58, %v1769_v58  ;;  %v1767_v7 = vmax.f32 %v1639_v60, 0.0 }
  0xf1   : > { %v2993_v5 = vpack.c.bf16 %v1833_v59, %v1833_v59  ;;  %v1831_v9 = vmax.f32 %v1703_v61, 0.0  ;;  %v1642_v10 = vadd.f32 %v3593_v8, %v1507_v0  ;;  %v1706_v11 = vadd.f32 %v3593_v8, %v1571_v1  ;;  %v3140_v14 = vpop.f32.mrf.mxu0  ;;  %v3204_v15 = vpop.f32.mrf.mxu1 }
  0xf2   : > { %2405 = vst.msk [vmem:[%s3608_s14 + $0x4] sm:$0xf] %vm2403_vm2, %v2924_v62  ;;  %2469 = vst.msk [vmem:[%s3608_s14 + $0x104] sm:$0xf] %vm2403_vm2, %v2988_v63  ;;  %v1505_v12 = vmul.f32 %v3588_v6, %v1001_v2  ;;  %v1569_v13 = vmul.f32 %v3588_v6, %v1257_v3  ;;  %v2927_v16 = vpack.c.bf16 %v1767_v7, %v1767_v7 }
  0xf3   : > { %2410 = vst.msk [vmem:[%s3608_s14 + $0x18] sm:$0xf] %vm2403_vm2, %v2929_v4  ;;  %2474 = vst.msk [vmem:[%s3608_s14 + $0x118] sm:$0xf] %vm2403_vm2, %v2993_v5  ;;  %v2991_v17 = vpack.c.bf16 %v1831_v9, %v1831_v9  ;;  %v1510_v18 = vmul.f32 %v3140_v14, %v3588_v6  ;;  %v1574_v19 = vmul.f32 %v3204_v15, %v3588_v6  ;;  %v1770_v20 = vmax.f32 %v1642_v10, 0.0  ;;  %v1014_v24 = vpop.f32.mrf.mxu0  ;;  %v1270_v25 = vpop.f32.mrf.mxu1 }
  0xf4   : > { %v1834_v21 = vmax.f32 %v1706_v11, 0.0  ;;  %v1640_v22 = vadd.f32 %v3593_v8, %v1505_v12  ;;  %v1704_v23 = vadd.f32 %v3593_v8, %v1569_v13  ;;  %2408 = vst.msk [vmem:[%s3608_s14 + $0x10] sm:$0xf] %vm2403_vm2, %v2927_v16  ;;  %v1508_v28 = vmul.f32 %v3588_v6, %v1014_v24 }
  0xf5   : > { %2472 = vst.msk [vmem:[%s3608_s14 + $0x110] sm:$0xf] %vm2403_vm2, %v2991_v17  ;;  %v1645_v26 = vadd.f32 %v3593_v8, %v1510_v18  ;;  %v1709_v27 = vadd.f32 %v3593_v8, %v1574_v19  ;;  %v1572_v29 = vmul.f32 %v3588_v6, %v1270_v25  ;;  %v2930_v30 = vpack.c.bf16 %v1770_v20, %v1770_v20  ;;  %v3141_v34 = vpop.f32.mrf.mxu0  ;;  %v3205_v35 = vpop.f32.mrf.mxu1 }
  0xf6   : > { %v2994_v31 = vpack.c.bf16 %v1834_v21, %v1834_v21  ;;  %v1768_v32 = vmax.f32 %v1640_v22, 0.0  ;;  %v1832_v33 = vmax.f32 %v1704_v23, 0.0  ;;  %v1643_v38 = vadd.f32 %v3593_v8, %v1508_v28 }
  0xf7   : > { %v1773_v36 = vmax.f32 %v1645_v26, 0.0  ;;  %v1837_v37 = vmax.f32 %v1709_v27, 0.0  ;;  %v1707_v39 = vadd.f32 %v3593_v8, %v1572_v29  ;;  %2411 = vst.msk [vmem:[%s3608_s14 + $0x1c] sm:$0xf] %vm2403_vm2, %v2930_v30  ;;  %v1511_v42 = vmul.f32 %v3141_v34, %v3588_v6  ;;  %v1017_v44 = vpop.f32.mrf.mxu0  ;;  %v1273_v45 = vpop.f32.mrf.mxu1 }
  0xf8   : > { %2475 = vst.msk [vmem:[%s3608_s14 + $0x11c] sm:$0xf] %vm2403_vm2, %v2994_v31  ;;  %v2928_v40 = vpack.c.bf16 %v1768_v32, %v1768_v32  ;;  %v2992_v41 = vpack.c.bf16 %v1832_v33, %v1832_v33  ;;  %v1575_v43 = vmul.f32 %v3205_v35, %v3588_v6  ;;  %v1771_v48 = vmax.f32 %v1643_v38, 0.0 }
  0xf9   : > { %v2933_v46 = vpack.c.bf16 %v1773_v36, %v1773_v36  ;;  %v2997_v47 = vpack.c.bf16 %v1837_v37, %v1837_v37  ;;  %v1835_v49 = vmax.f32 %v1707_v39, 0.0  ;;  %v1646_v50 = vadd.f32 %v3593_v8, %v1511_v42  ;;  %v3144_v54 = vpop.f32.mrf.mxu0  ;;  %v3208_v55 = vpop.f32.mrf.mxu1 }
  0xfa   : > { %2409 = vst.msk [vmem:[%s3608_s14 + $0x14] sm:$0xf] %vm2403_vm2, %v2928_v40  ;;  %2473 = vst.msk [vmem:[%s3608_s14 + $0x114] sm:$0xf] %vm2403_vm2, %v2992_v41  ;;  %v1710_v51 = vadd.f32 %v3593_v8, %v1575_v43  ;;  %v1509_v52 = vmul.f32 %v3588_v6, %v1017_v44  ;;  %v1573_v53 = vmul.f32 %v3588_v6, %v1273_v45 }
  0xfb   : > { %2414 = vst.msk [vmem:[%s3608_s14 + $0x28] sm:$0xf] %vm2403_vm2, %v2933_v46  ;;  %2478 = vst.msk [vmem:[%s3608_s14 + $0x128] sm:$0xf] %vm2403_vm2, %v2997_v47  ;;  %v2931_v56 = vpack.c.bf16 %v1771_v48, %v1771_v48  ;;  %v2995_v57 = vpack.c.bf16 %v1835_v49, %v1835_v49  ;;  %v1514_v58 = vmul.f32 %v3144_v54, %v3588_v6  ;;  %v1774_v60 = vmax.f32 %v1646_v50, 0.0  ;;  %v1030_v0 = vpop.f32.mrf.mxu0  ;;  %v1286_v1 = vpop.f32.mrf.mxu1 }
  0xfc   : > { %v1578_v59 = vmul.f32 %v3208_v55, %v3588_v6  ;;  %v1838_v61 = vmax.f32 %v1710_v51, 0.0  ;;  %v1644_v62 = vadd.f32 %v3593_v8, %v1509_v52  ;;  %v1708_v63 = vadd.f32 %v3593_v8, %v1573_v53 }
  0xfd   : > { %2412 = vst.msk [vmem:[%s3608_s14 + $0x20] sm:$0xf] %vm2403_vm2, %v2931_v56  ;;  %2476 = vst.msk [vmem:[%s3608_s14 + $0x120] sm:$0xf] %vm2403_vm2, %v2995_v57  ;;  %v1649_v2 = vadd.f32 %v3593_v8, %v1514_v58  ;;  %v1512_v4 = vmul.f32 %v3588_v6, %v1030_v0  ;;  %v1576_v5 = vmul.f32 %v3588_v6, %v1286_v1  ;;  %v3145_v12 = vpop.f32.mrf.mxu0  ;;  %v3209_v13 = vpop.f32.mrf.mxu1 }
  0xfe   : > { %v1713_v3 = vadd.f32 %v3593_v8, %v1578_v59  ;;  %v2934_v7 = vpack.c.bf16 %v1774_v60, %v1774_v60  ;;  %v2998_v9 = vpack.c.bf16 %v1838_v61, %v1838_v61  ;;  %v1772_v10 = vmax.f32 %v1644_v62, 0.0 }
  0xff   : > { %v1836_v11 = vmax.f32 %v1708_v63, 0.0  ;;  %v1777_v14 = vmax.f32 %v1649_v2, 0.0  ;;  %v1647_v16 = vadd.f32 %v3593_v8, %v1512_v4  ;;  %v1711_v17 = vadd.f32 %v3593_v8, %v1576_v5  ;;  %v1033_v22 = vpop.f32.mrf.mxu0  ;;  %v1289_v23 = vpop.f32.mrf.mxu1 }
 0x100   : > { %v1841_v15 = vmax.f32 %v1713_v3, 0.0  ;;  %2415 = vst.msk [vmem:[%s3608_s14 + $0x2c] sm:$0xf] %vm2403_vm2, %v2934_v7  ;;  %2479 = vst.msk [vmem:[%s3608_s14 + $0x12c] sm:$0xf] %vm2403_vm2, %v2998_v9  ;;  %v2932_v18 = vpack.c.bf16 %v1772_v10, %v1772_v10  ;;  %v1515_v20 = vmul.f32 %v3145_v12, %v3588_v6  ;;  %v1579_v21 = vmul.f32 %v3209_v13, %v3588_v6 }
 0x101   : > { %v2996_v19 = vpack.c.bf16 %v1836_v11, %v1836_v11  ;;  %v2937_v24 = vpack.c.bf16 %v1777_v14, %v1777_v14  ;;  %v1775_v26 = vmax.f32 %v1647_v16, 0.0  ;;  %v1839_v27 = vmax.f32 %v1711_v17, 0.0  ;;  %v3148_v32 = vpop.f32.mrf.mxu0  ;;  %v3212_v33 = vpop.f32.mrf.mxu1 }
 0x102   : > { %v3001_v25 = vpack.c.bf16 %v1841_v15, %v1841_v15  ;;  %2413 = vst.msk [vmem:[%s3608_s14 + $0x24] sm:$0xf] %vm2403_vm2, %v2932_v18  ;;  %v1650_v28 = vadd.f32 %v3593_v8, %v1515_v20  ;;  %v1714_v29 = vadd.f32 %v3593_v8, %v1579_v21  ;;  %v1513_v30 = vmul.f32 %v3588_v6, %v1033_v22 }
 0x103   : > { %2477 = vst.msk [vmem:[%s3608_s14 + $0x124] sm:$0xf] %vm2403_vm2, %v2996_v19  ;;  %v1577_v31 = vmul.f32 %v3588_v6, %v1289_v23  ;;  %2418 = vst.msk [vmem:[%s3608_s14 + $0x38] sm:$0xf] %vm2403_vm2, %v2937_v24  ;;  %v2935_v34 = vpack.c.bf16 %v1775_v26, %v1775_v26  ;;  %v2999_v35 = vpack.c.bf16 %v1839_v27, %v1839_v27  ;;  %v1046_v42 = vpop.f32.mrf.mxu0  ;;  %v1302_v43 = vpop.f32.mrf.mxu1 }
 0x104   : > { %2482 = vst.msk [vmem:[%s3608_s14 + $0x138] sm:$0xf] %vm2403_vm2, %v3001_v25  ;;  %v1518_v36 = vmul.f32 %v3148_v32, %v3588_v6  ;;  %v1582_v37 = vmul.f32 %v3212_v33, %v3588_v6  ;;  %v1778_v38 = vmax.f32 %v1650_v28, 0.0  ;;  %v1842_v39 = vmax.f32 %v1714_v29, 0.0 }
 0x105   : > { %v1648_v40 = vadd.f32 %v3593_v8, %v1513_v30  ;;  %v1712_v41 = vadd.f32 %v3593_v8, %v1577_v31  ;;  %2416 = vst.msk [vmem:[%s3608_s14 + $0x30] sm:$0xf] %vm2403_vm2, %v2935_v34  ;;  %2480 = vst.msk [vmem:[%s3608_s14 + $0x130] sm:$0xf] %vm2403_vm2, %v2999_v35  ;;  %v1516_v46 = vmul.f32 %v3588_v6, %v1046_v42  ;;  %v3149_v52 = vpop.f32.mrf.mxu0  ;;  %v3213_v53 = vpop.f32.mrf.mxu1 }
 0x106   : > { %v1653_v44 = vadd.f32 %v3593_v8, %v1518_v36  ;;  %v1717_v45 = vadd.f32 %v3593_v8, %v1582_v37  ;;  %v1580_v47 = vmul.f32 %v3588_v6, %v1302_v43  ;;  %v2938_v48 = vpack.c.bf16 %v1778_v38, %v1778_v38 }
 0x107   : > { %v3002_v49 = vpack.c.bf16 %v1842_v39, %v1842_v39  ;;  %v1776_v50 = vmax.f32 %v1648_v40, 0.0  ;;  %v1840_v51 = vmax.f32 %v1712_v41, 0.0  ;;  %v1651_v56 = vadd.f32 %v3593_v8, %v1516_v46  ;;  %v1049_v62 = vpop.f32.mrf.mxu0  ;;  %v1305_v63 = vpop.f32.mrf.mxu1 }
 0x108   : > { %v1781_v54 = vmax.f32 %v1653_v44, 0.0  ;;  %v1845_v55 = vmax.f32 %v1717_v45, 0.0  ;;  %v1715_v57 = vadd.f32 %v3593_v8, %v1580_v47  ;;  %2419 = vst.msk [vmem:[%s3608_s14 + $0x3c] sm:$0xf] %vm2403_vm2, %v2938_v48  ;;  %v1519_v60 = vmul.f32 %v3149_v52, %v3588_v6 }
 0x109   : > { %2483 = vst.msk [vmem:[%s3608_s14 + $0x13c] sm:$0xf] %vm2403_vm2, %v3002_v49  ;;  %v2936_v58 = vpack.c.bf16 %v1776_v50, %v1776_v50  ;;  %v3000_v59 = vpack.c.bf16 %v1840_v51, %v1840_v51  ;;  %v1583_v61 = vmul.f32 %v3213_v53, %v3588_v6  ;;  %v1779_v2 = vmax.f32 %v1651_v56, 0.0  ;;  %v3152_v10 = vpop.f32.mrf.mxu0  ;;  %v3216_v11 = vpop.f32.mrf.mxu1 }
 0x10a   : > { %v2941_v0 = vpack.c.bf16 %v1781_v54, %v1781_v54  ;;  %v3005_v1 = vpack.c.bf16 %v1845_v55, %v1845_v55  ;;  %v1843_v3 = vmax.f32 %v1715_v57, 0.0  ;;  %v1654_v4 = vadd.f32 %v3593_v8, %v1519_v60 }
 0x10b   : > { %2417 = vst.msk [vmem:[%s3608_s14 + $0x34] sm:$0xf] %vm2403_vm2, %v2936_v58  ;;  %2481 = vst.msk [vmem:[%s3608_s14 + $0x134] sm:$0xf] %vm2403_vm2, %v3000_v59  ;;  %v1718_v5 = vadd.f32 %v3593_v8, %v1583_v61  ;;  %v1517_v7 = vmul.f32 %v3588_v6, %v1049_v62  ;;  %v1581_v9 = vmul.f32 %v3588_v6, %v1305_v63  ;;  %v1062_v20 = vpop.f32.mrf.mxu0  ;;  %v1318_v21 = vpop.f32.mrf.mxu1 }
 0x10c   : > { %2422 = vst.msk [vmem:[%s3608_s14 + $0x48] sm:$0xf] %vm2403_vm2, %v2941_v0  ;;  %2486 = vst.msk [vmem:[%s3608_s14 + $0x148] sm:$0xf] %vm2403_vm2, %v3005_v1  ;;  %v2939_v12 = vpack.c.bf16 %v1779_v2, %v1779_v2  ;;  %v3003_v13 = vpack.c.bf16 %v1843_v3, %v1843_v3  ;;  %v1522_v14 = vmul.f32 %v3152_v10, %v3588_v6  ;;  %v1782_v16 = vmax.f32 %v1654_v4, 0.0 }
 0x10d   : > { %v1586_v15 = vmul.f32 %v3216_v11, %v3588_v6  ;;  %v1846_v17 = vmax.f32 %v1718_v5, 0.0  ;;  %v1652_v18 = vadd.f32 %v3593_v8, %v1517_v7  ;;  %v1716_v19 = vadd.f32 %v3593_v8, %v1581_v9  ;;  %v3153_v30 = vpop.f32.mrf.mxu0  ;;  %v3217_v31 = vpop.f32.mrf.mxu1 }
 0x10e   : > { %2420 = vst.msk [vmem:[%s3608_s14 + $0x40] sm:$0xf] %vm2403_vm2, %v2939_v12  ;;  %2484 = vst.msk [vmem:[%s3608_s14 + $0x140] sm:$0xf] %vm2403_vm2, %v3003_v13  ;;  %v1657_v22 = vadd.f32 %v3593_v8, %v1522_v14  ;;  %v1520_v24 = vmul.f32 %v3588_v6, %v1062_v20  ;;  %v1584_v25 = vmul.f32 %v3588_v6, %v1318_v21 }
 0x10f   : > { %v1721_v23 = vadd.f32 %v3593_v8, %v1586_v15  ;;  %v2942_v26 = vpack.c.bf16 %v1782_v16, %v1782_v16  ;;  %v3006_v27 = vpack.c.bf16 %v1846_v17, %v1846_v17  ;;  %v1780_v28 = vmax.f32 %v1652_v18, 0.0  ;;  %v1065_v40 = vpop.f32.mrf.mxu0  ;;  %v1321_v41 = vpop.f32.mrf.mxu1 }
 0x110   : > { %v1844_v29 = vmax.f32 %v1716_v19, 0.0  ;;  %v1785_v32 = vmax.f32 %v1657_v22, 0.0  ;;  %v1655_v34 = vadd.f32 %v3593_v8, %v1520_v24  ;;  %v1719_v35 = vadd.f32 %v3593_v8, %v1584_v25 }
 0x111   : > { %v1849_v33 = vmax.f32 %v1721_v23, 0.0  ;;  %2423 = vst.msk [vmem:[%s3608_s14 + $0x4c] sm:$0xf] %vm2403_vm2, %v2942_v26  ;;  %2487 = vst.msk [vmem:[%s3608_s14 + $0x14c] sm:$0xf] %vm2403_vm2, %v3006_v27  ;;  %v2940_v36 = vpack.c.bf16 %v1780_v28, %v1780_v28  ;;  %v1523_v38 = vmul.f32 %v3153_v30, %v3588_v6  ;;  %v1587_v39 = vmul.f32 %v3217_v31, %v3588_v6  ;;  %v3156_v50 = vpop.f32.mrf.mxu0  ;;  %v3220_v51 = vpop.f32.mrf.mxu1 }
 0x112   : > { %v3004_v37 = vpack.c.bf16 %v1844_v29, %v1844_v29  ;;  %v2945_v42 = vpack.c.bf16 %v1785_v32, %v1785_v32  ;;  %v1783_v44 = vmax.f32 %v1655_v34, 0.0  ;;  %v1847_v45 = vmax.f32 %v1719_v35, 0.0 }
 0x113   : > { %v3009_v43 = vpack.c.bf16 %v1849_v33, %v1849_v33  ;;  %2421 = vst.msk [vmem:[%s3608_s14 + $0x44] sm:$0xf] %vm2403_vm2, %v2940_v36  ;;  %v1658_v46 = vadd.f32 %v3593_v8, %v1523_v38  ;;  %v1722_v47 = vadd.f32 %v3593_v8, %v1587_v39  ;;  %v1521_v48 = vmul.f32 %v3588_v6, %v1065_v40  ;;  %v1078_v60 = vpop.f32.mrf.mxu0  ;;  %v1334_v61 = vpop.f32.mrf.mxu1 }
 0x114   : > { %2485 = vst.msk [vmem:[%s3608_s14 + $0x144] sm:$0xf] %vm2403_vm2, %v3004_v37  ;;  %v1585_v49 = vmul.f32 %v3588_v6, %v1321_v41  ;;  %2426 = vst.msk [vmem:[%s3608_s14 + $0x58] sm:$0xf] %vm2403_vm2, %v2945_v42  ;;  %v2943_v52 = vpack.c.bf16 %v1783_v44, %v1783_v44  ;;  %v3007_v53 = vpack.c.bf16 %v1847_v45, %v1847_v45 }
 0x115   : > { %2490 = vst.msk [vmem:[%s3608_s14 + $0x158] sm:$0xf] %vm2403_vm2, %v3009_v43  ;;  %v1526_v54 = vmul.f32 %v3156_v50, %v3588_v6  ;;  %v1590_v55 = vmul.f32 %v3220_v51, %v3588_v6  ;;  %v1786_v56 = vmax.f32 %v1658_v46, 0.0  ;;  %v1850_v57 = vmax.f32 %v1722_v47, 0.0  ;;  %v3157_v7 = vpop.f32.mrf.mxu0  ;;  %v3221_v9 = vpop.f32.mrf.mxu1 }
 0x116   : > { %v1656_v58 = vadd.f32 %v3593_v8, %v1521_v48  ;;  %v1720_v59 = vadd.f32 %v3593_v8, %v1585_v49  ;;  %2424 = vst.msk [vmem:[%s3608_s14 + $0x50] sm:$0xf] %vm2403_vm2, %v2943_v52  ;;  %2488 = vst.msk [vmem:[%s3608_s14 + $0x150] sm:$0xf] %vm2403_vm2, %v3007_v53  ;;  %v1524_v0 = vmul.f32 %v3588_v6, %v1078_v60 }
 0x117   : > { %v1661_v62 = vadd.f32 %v3593_v8, %v1526_v54  ;;  %v1725_v63 = vadd.f32 %v3593_v8, %v1590_v55  ;;  %v1588_v1 = vmul.f32 %v3588_v6, %v1334_v61  ;;  %v2946_v2 = vpack.c.bf16 %v1786_v56, %v1786_v56  ;;  %v1081_v18 = vpop.f32.mrf.mxu0  ;;  %v1337_v19 = vpop.f32.mrf.mxu1 }
 0x118   : > { %v3010_v3 = vpack.c.bf16 %v1850_v57, %v1850_v57  ;;  %v1784_v4 = vmax.f32 %v1656_v58, 0.0  ;;  %v1848_v5 = vmax.f32 %v1720_v59, 0.0  ;;  %v1659_v12 = vadd.f32 %v3593_v8, %v1524_v0 }
 0x119   : > { %v1789_v10 = vmax.f32 %v1661_v62, 0.0  ;;  %v1853_v11 = vmax.f32 %v1725_v63, 0.0  ;;  %v1723_v13 = vadd.f32 %v3593_v8, %v1588_v1  ;;  %2427 = vst.msk [vmem:[%s3608_s14 + $0x5c] sm:$0xf] %vm2403_vm2, %v2946_v2  ;;  %v1527_v16 = vmul.f32 %v3157_v7, %v3588_v6  ;;  %v3160_v28 = vpop.f32.mrf.mxu0  ;;  %v3224_v29 = vpop.f32.mrf.mxu1 }
 0x11a   : > { %2491 = vst.msk [vmem:[%s3608_s14 + $0x15c] sm:$0xf] %vm2403_vm2, %v3010_v3  ;;  %v2944_v14 = vpack.c.bf16 %v1784_v4, %v1784_v4  ;;  %v3008_v15 = vpack.c.bf16 %v1848_v5, %v1848_v5  ;;  %v1591_v17 = vmul.f32 %v3221_v9, %v3588_v6  ;;  %v1787_v22 = vmax.f32 %v1659_v12, 0.0 }
 0x11b   : > { %v2949_v20 = vpack.c.bf16 %v1789_v10, %v1789_v10  ;;  %v3013_v21 = vpack.c.bf16 %v1853_v11, %v1853_v11  ;;  %v1851_v23 = vmax.f32 %v1723_v13, 0.0  ;;  %v1662_v24 = vadd.f32 %v3593_v8, %v1527_v16  ;;  %v1094_v38 = vpop.f32.mrf.mxu0  ;;  %v1350_v39 = vpop.f32.mrf.mxu1 }
 0x11c   : > { %2425 = vst.msk [vmem:[%s3608_s14 + $0x54] sm:$0xf] %vm2403_vm2, %v2944_v14  ;;  %2489 = vst.msk [vmem:[%s3608_s14 + $0x154] sm:$0xf] %vm2403_vm2, %v3008_v15  ;;  %v1726_v25 = vadd.f32 %v3593_v8, %v1591_v17  ;;  %v1525_v26 = vmul.f32 %v3588_v6, %v1081_v18  ;;  %v1589_v27 = vmul.f32 %v3588_v6, %v1337_v19 }
 0x11d   : > { %2430 = vst.msk [vmem:[%s3608_s14 + $0x68] sm:$0xf] %vm2403_vm2, %v2949_v20  ;;  %2494 = vst.msk [vmem:[%s3608_s14 + $0x168] sm:$0xf] %vm2403_vm2, %v3013_v21  ;;  %v2947_v30 = vpack.c.bf16 %v1787_v22, %v1787_v22  ;;  %v3011_v31 = vpack.c.bf16 %v1851_v23, %v1851_v23  ;;  %v1530_v32 = vmul.f32 %v3160_v28, %v3588_v6  ;;  %v1790_v34 = vmax.f32 %v1662_v24, 0.0  ;;  %v3161_v48 = vpop.f32.mrf.mxu0  ;;  %v3225_v49 = vpop.f32.mrf.mxu1 }
 0x11e   : > { %v1594_v33 = vmul.f32 %v3224_v29, %v3588_v6  ;;  %v1854_v35 = vmax.f32 %v1726_v25, 0.0  ;;  %v1660_v36 = vadd.f32 %v3593_v8, %v1525_v26  ;;  %v1724_v37 = vadd.f32 %v3593_v8, %v1589_v27 }
 0x11f   : > { %2428 = vst.msk [vmem:[%s3608_s14 + $0x60] sm:$0xf] %vm2403_vm2, %v2947_v30  ;;  %2492 = vst.msk [vmem:[%s3608_s14 + $0x160] sm:$0xf] %vm2403_vm2, %v3011_v31  ;;  %v1665_v40 = vadd.f32 %v3593_v8, %v1530_v32  ;;  %v1528_v42 = vmul.f32 %v3588_v6, %v1094_v38  ;;  %v1592_v43 = vmul.f32 %v3588_v6, %v1350_v39  ;;  %v1097_v58 = vpop.f32.mrf.mxu0  ;;  %v1353_v59 = vpop.f32.mrf.mxu1 }
 0x120   : > { %v1729_v41 = vadd.f32 %v3593_v8, %v1594_v33  ;;  %v2950_v44 = vpack.c.bf16 %v1790_v34, %v1790_v34  ;;  %v3014_v45 = vpack.c.bf16 %v1854_v35, %v1854_v35  ;;  %v1788_v46 = vmax.f32 %v1660_v36, 0.0 }
 0x121   : > { %v1852_v47 = vmax.f32 %v1724_v37, 0.0  ;;  %v1793_v50 = vmax.f32 %v1665_v40, 0.0  ;;  %v1663_v52 = vadd.f32 %v3593_v8, %v1528_v42  ;;  %v1727_v53 = vadd.f32 %v3593_v8, %v1592_v43  ;;  %v3164_v4 = vpop.f32.mrf.mxu0  ;;  %v3228_v5 = vpop.f32.mrf.mxu1 }
 0x122   : > { %v1857_v51 = vmax.f32 %v1729_v41, 0.0  ;;  %2431 = vst.msk [vmem:[%s3608_s14 + $0x6c] sm:$0xf] %vm2403_vm2, %v2950_v44  ;;  %2495 = vst.msk [vmem:[%s3608_s14 + $0x16c] sm:$0xf] %vm2403_vm2, %v3014_v45  ;;  %v2948_v54 = vpack.c.bf16 %v1788_v46, %v1788_v46  ;;  %v1531_v56 = vmul.f32 %v3161_v48, %v3588_v6  ;;  %v1595_v57 = vmul.f32 %v3225_v49, %v3588_v6 }
 0x123   : > { %v3012_v55 = vpack.c.bf16 %v1852_v47, %v1852_v47  ;;  %v2953_v60 = vpack.c.bf16 %v1793_v50, %v1793_v50  ;;  %v1791_v62 = vmax.f32 %v1663_v52, 0.0  ;;  %v1855_v63 = vmax.f32 %v1727_v53, 0.0  ;;  %v1110_v16 = vpop.f32.mrf.mxu0  ;;  %v1366_v17 = vpop.f32.mrf.mxu1 }
 0x124   : > { %v3017_v61 = vpack.c.bf16 %v1857_v51, %v1857_v51  ;;  %2429 = vst.msk [vmem:[%s3608_s14 + $0x64] sm:$0xf] %vm2403_vm2, %v2948_v54  ;;  %v1666_v0 = vadd.f32 %v3593_v8, %v1531_v56  ;;  %v1730_v1 = vadd.f32 %v3593_v8, %v1595_v57  ;;  %v1529_v2 = vmul.f32 %v3588_v6, %v1097_v58 }
 0x125   : > { %2493 = vst.msk [vmem:[%s3608_s14 + $0x164] sm:$0xf] %vm2403_vm2, %v3012_v55  ;;  %v1593_v3 = vmul.f32 %v3588_v6, %v1353_v59  ;;  %2434 = vst.msk [vmem:[%s3608_s14 + $0x78] sm:$0xf] %vm2403_vm2, %v2953_v60  ;;  %v2951_v7 = vpack.c.bf16 %v1791_v62, %v1791_v62  ;;  %v3015_v9 = vpack.c.bf16 %v1855_v63, %v1855_v63  ;;  %v3165_v26 = vpop.f32.mrf.mxu0  ;;  %v3229_v27 = vpop.f32.mrf.mxu1 }
 0x126   : > { %2498 = vst.msk [vmem:[%s3608_s14 + $0x178] sm:$0xf] %vm2403_vm2, %v3017_v61  ;;  %v1534_v10 = vmul.f32 %v3164_v4, %v3588_v6  ;;  %v1598_v11 = vmul.f32 %v3228_v5, %v3588_v6  ;;  %v1794_v12 = vmax.f32 %v1666_v0, 0.0  ;;  %v1858_v13 = vmax.f32 %v1730_v1, 0.0 }
 0x127   : > { %v1664_v14 = vadd.f32 %v3593_v8, %v1529_v2  ;;  %v1728_v15 = vadd.f32 %v3593_v8, %v1593_v3  ;;  %2432 = vst.msk [vmem:[%s3608_s14 + $0x70] sm:$0xf] %vm2403_vm2, %v2951_v7  ;;  %2496 = vst.msk [vmem:[%s3608_s14 + $0x170] sm:$0xf] %vm2403_vm2, %v3015_v9  ;;  %v1532_v20 = vmul.f32 %v3588_v6, %v1110_v16  ;;  %v1113_v36 = vpop.f32.mrf.mxu0  ;;  %v1369_v37 = vpop.f32.mrf.mxu1 }
 0x128   : > { %v1669_v18 = vadd.f32 %v3593_v8, %v1534_v10  ;;  %v1733_v19 = vadd.f32 %v3593_v8, %v1598_v11  ;;  %v1596_v21 = vmul.f32 %v3588_v6, %v1366_v17  ;;  %v2954_v22 = vpack.c.bf16 %v1794_v12, %v1794_v12 }
 0x129   : > { %v3018_v23 = vpack.c.bf16 %v1858_v13, %v1858_v13  ;;  %v1792_v24 = vmax.f32 %v1664_v14, 0.0  ;;  %v1856_v25 = vmax.f32 %v1728_v15, 0.0  ;;  %v1667_v30 = vadd.f32 %v3593_v8, %v1532_v20  ;;  %v3168_v46 = vpop.f32.mrf.mxu0  ;;  %v3232_v47 = vpop.f32.mrf.mxu1 }
 0x12a   : > { %v1797_v28 = vmax.f32 %v1669_v18, 0.0  ;;  %v1861_v29 = vmax.f32 %v1733_v19, 0.0  ;;  %v1731_v31 = vadd.f32 %v3593_v8, %v1596_v21  ;;  %2435 = vst.msk [vmem:[%s3608_s14 + $0x7c] sm:$0xf] %vm2403_vm2, %v2954_v22  ;;  %v1535_v34 = vmul.f32 %v3165_v26, %v3588_v6 }
 0x12b   : > { %2499 = vst.msk [vmem:[%s3608_s14 + $0x17c] sm:$0xf] %vm2403_vm2, %v3018_v23  ;;  %v2952_v32 = vpack.c.bf16 %v1792_v24, %v1792_v24  ;;  %v3016_v33 = vpack.c.bf16 %v1856_v25, %v1856_v25  ;;  %v1599_v35 = vmul.f32 %v3229_v27, %v3588_v6  ;;  %v1795_v40 = vmax.f32 %v1667_v30, 0.0  ;;  %v1126_v56 = vpop.f32.mrf.mxu0  ;;  %v1382_v57 = vpop.f32.mrf.mxu1 }
 0x12c   : > { %v2957_v38 = vpack.c.bf16 %v1797_v28, %v1797_v28  ;;  %v3021_v39 = vpack.c.bf16 %v1861_v29, %v1861_v29  ;;  %v1859_v41 = vmax.f32 %v1731_v31, 0.0  ;;  %v1670_v42 = vadd.f32 %v3593_v8, %v1535_v34 }
 0x12d   : > { %2433 = vst.msk [vmem:[%s3608_s14 + $0x74] sm:$0xf] %vm2403_vm2, %v2952_v32  ;;  %2497 = vst.msk [vmem:[%s3608_s14 + $0x174] sm:$0xf] %vm2403_vm2, %v3016_v33  ;;  %v1734_v43 = vadd.f32 %v3593_v8, %v1599_v35  ;;  %v1533_v44 = vmul.f32 %v3588_v6, %v1113_v36  ;;  %v1597_v45 = vmul.f32 %v3588_v6, %v1369_v37  ;;  %v3169_v2 = vpop.f32.mrf.mxu0  ;;  %v3233_v3 = vpop.f32.mrf.mxu1 }
 0x12e   : > { %2438 = vst.msk [vmem:[%s3608_s14 + $0x88] sm:$0xf] %vm2403_vm2, %v2957_v38  ;;  %2502 = vst.msk [vmem:[%s3608_s14 + $0x188] sm:$0xf] %vm2403_vm2, %v3021_v39  ;;  %v2955_v48 = vpack.c.bf16 %v1795_v40, %v1795_v40  ;;  %v3019_v49 = vpack.c.bf16 %v1859_v41, %v1859_v41  ;;  %v1538_v50 = vmul.f32 %v3168_v46, %v3588_v6  ;;  %v1798_v52 = vmax.f32 %v1670_v42, 0.0 }
 0x12f   : > { %v1602_v51 = vmul.f32 %v3232_v47, %v3588_v6  ;;  %v1862_v53 = vmax.f32 %v1734_v43, 0.0  ;;  %v1668_v54 = vadd.f32 %v3593_v8, %v1533_v44  ;;  %v1732_v55 = vadd.f32 %v3593_v8, %v1597_v45  ;;  %v1129_v14 = vpop.f32.mrf.mxu0  ;;  %v1385_v15 = vpop.f32.mrf.mxu1 }
 0x130   : > { %2436 = vst.msk [vmem:[%s3608_s14 + $0x80] sm:$0xf] %vm2403_vm2, %v2955_v48  ;;  %2500 = vst.msk [vmem:[%s3608_s14 + $0x180] sm:$0xf] %vm2403_vm2, %v3019_v49  ;;  %v1673_v58 = vadd.f32 %v3593_v8, %v1538_v50  ;;  %v1536_v60 = vmul.f32 %v3588_v6, %v1126_v56  ;;  %v1600_v61 = vmul.f32 %v3588_v6, %v1382_v57 }
 0x131   : > { %v1737_v59 = vadd.f32 %v3593_v8, %v1602_v51  ;;  %v2958_v62 = vpack.c.bf16 %v1798_v52, %v1798_v52  ;;  %v3022_v63 = vpack.c.bf16 %v1862_v53, %v1862_v53  ;;  %v1796_v0 = vmax.f32 %v1668_v54, 0.0  ;;  %v3172_v24 = vpop.f32.mrf.mxu0  ;;  %v3236_v25 = vpop.f32.mrf.mxu1 }
 0x132   : > { %v1860_v1 = vmax.f32 %v1732_v55, 0.0  ;;  %v1801_v4 = vmax.f32 %v1673_v58, 0.0  ;;  %v1671_v7 = vadd.f32 %v3593_v8, %v1536_v60  ;;  %v1735_v9 = vadd.f32 %v3593_v8, %v1600_v61 }
 0x133   : > { %v1865_v5 = vmax.f32 %v1737_v59, 0.0  ;;  %2439 = vst.msk [vmem:[%s3608_s14 + $0x8c] sm:$0xf] %vm2403_vm2, %v2958_v62  ;;  %2503 = vst.msk [vmem:[%s3608_s14 + $0x18c] sm:$0xf] %vm2403_vm2, %v3022_v63  ;;  %v2956_v10 = vpack.c.bf16 %v1796_v0, %v1796_v0  ;;  %v1539_v12 = vmul.f32 %v3169_v2, %v3588_v6  ;;  %v1603_v13 = vmul.f32 %v3233_v3, %v3588_v6  ;;  %v1142_v34 = vpop.f32.mrf.mxu0  ;;  %v1398_v35 = vpop.f32.mrf.mxu1 }
 0x134   : > { %v3020_v11 = vpack.c.bf16 %v1860_v1, %v1860_v1  ;;  %v2961_v16 = vpack.c.bf16 %v1801_v4, %v1801_v4  ;;  %v1799_v18 = vmax.f32 %v1671_v7, 0.0  ;;  %v1863_v19 = vmax.f32 %v1735_v9, 0.0  ;;  %v3943_v4 = vld [vmem:[%s4135_s2] ss:$0 sm:$0xff] }
 0x135   : > { %v3025_v17 = vpack.c.bf16 %v1865_v5, %v1865_v5  ;;  %2437 = vst.msk [vmem:[%s3608_s14 + $0x84] sm:$0xf] %vm2403_vm2, %v2956_v10  ;;  %v1674_v20 = vadd.f32 %v3593_v8, %v1539_v12  ;;  %v1738_v21 = vadd.f32 %v3593_v8, %v1603_v13  ;;  %v1537_v22 = vmul.f32 %v3588_v6, %v1129_v14  ;;  %v3173_v44 = vpop.f32.mrf.mxu0  ;;  %v3237_v45 = vpop.f32.mrf.mxu1  ;;  %v3950_v9 = vld [vmem:[%s4136_s3] ss:$0 sm:$0xff] }
 0x136   : > { %2501 = vst.msk [vmem:[%s3608_s14 + $0x184] sm:$0xf] %vm2403_vm2, %v3020_v11  ;;  %v1601_v23 = vmul.f32 %v3588_v6, %v1385_v15  ;;  %2442 = vst.msk [vmem:[%s3608_s14 + $0x98] sm:$0xf] %vm2403_vm2, %v2961_v16  ;;  %v2959_v26 = vpack.c.bf16 %v1799_v18, %v1799_v18  ;;  %v3023_v27 = vpack.c.bf16 %v1863_v19, %v1863_v19 }
 0x137   : > { %2506 = vst.msk [vmem:[%s3608_s14 + $0x198] sm:$0xf] %vm2403_vm2, %v3025_v17  ;;  %v1542_v28 = vmul.f32 %v3172_v24, %v3588_v6  ;;  %v1606_v29 = vmul.f32 %v3236_v25, %v3588_v6  ;;  %v1802_v30 = vmax.f32 %v1674_v20, 0.0  ;;  %v1866_v31 = vmax.f32 %v1738_v21, 0.0  ;;  %v1145_v54 = vpop.f32.mrf.mxu0  ;;  %v1401_v55 = vpop.f32.mrf.mxu1 }
 0x138   : > { %v1672_v32 = vadd.f32 %v3593_v8, %v1537_v22  ;;  %v1736_v33 = vadd.f32 %v3593_v8, %v1601_v23  ;;  %2440 = vst.msk [vmem:[%s3608_s14 + $0x90] sm:$0xf] %vm2403_vm2, %v2959_v26  ;;  %2504 = vst.msk [vmem:[%s3608_s14 + $0x190] sm:$0xf] %vm2403_vm2, %v3023_v27  ;;  %v1540_v38 = vmul.f32 %v3588_v6, %v1142_v34 }
 0x139   : > { %v1677_v36 = vadd.f32 %v3593_v8, %v1542_v28  ;;  %v1741_v37 = vadd.f32 %v3593_v8, %v1606_v29  ;;  %v1604_v39 = vmul.f32 %v3588_v6, %v1398_v35  ;;  %v2962_v40 = vpack.c.bf16 %v1802_v30, %v1802_v30  ;;  %v3176_v0 = vpop.f32.mrf.mxu0  ;;  %v3240_v1 = vpop.f32.mrf.mxu1 }
 0x13a   : > { %v3026_v41 = vpack.c.bf16 %v1866_v31, %v1866_v31  ;;  %v1800_v42 = vmax.f32 %v1672_v32, 0.0  ;;  %v1864_v43 = vmax.f32 %v1736_v33, 0.0  ;;  %v1675_v48 = vadd.f32 %v3593_v8, %v1540_v38 }
 0x13b   : > { %v1805_v46 = vmax.f32 %v1677_v36, 0.0  ;;  %v1869_v47 = vmax.f32 %v1741_v37, 0.0  ;;  %v1739_v49 = vadd.f32 %v3593_v8, %v1604_v39  ;;  %2443 = vst.msk [vmem:[%s3608_s14 + $0x9c] sm:$0xf] %vm2403_vm2, %v2962_v40  ;;  %v1543_v52 = vmul.f32 %v3173_v44, %v3588_v6  ;;  %v1158_v12 = vpop.f32.mrf.mxu0  ;;  %v1414_v13 = vpop.f32.mrf.mxu1 }
 0x13c   : > { %2507 = vst.msk [vmem:[%s3608_s14 + $0x19c] sm:$0xf] %vm2403_vm2, %v3026_v41  ;;  %v2960_v50 = vpack.c.bf16 %v1800_v42, %v1800_v42  ;;  %v3024_v51 = vpack.c.bf16 %v1864_v43, %v1864_v43  ;;  %v1607_v53 = vmul.f32 %v3237_v45, %v3588_v6  ;;  %v1803_v58 = vmax.f32 %v1675_v48, 0.0 }
 0x13d   : > { %v2965_v56 = vpack.c.bf16 %v1805_v46, %v1805_v46  ;;  %v3029_v57 = vpack.c.bf16 %v1869_v47, %v1869_v47  ;;  %v1867_v59 = vmax.f32 %v1739_v49, 0.0  ;;  %v1678_v60 = vadd.f32 %v3593_v8, %v1543_v52  ;;  %v3177_v22 = vpop.f32.mrf.mxu0  ;;  %v3241_v23 = vpop.f32.mrf.mxu1 }
 0x13e   : > { %2441 = vst.msk [vmem:[%s3608_s14 + $0x94] sm:$0xf] %vm2403_vm2, %v2960_v50  ;;  %2505 = vst.msk [vmem:[%s3608_s14 + $0x194] sm:$0xf] %vm2403_vm2, %v3024_v51  ;;  %v1742_v61 = vadd.f32 %v3593_v8, %v1607_v53  ;;  %v1541_v62 = vmul.f32 %v3588_v6, %v1145_v54  ;;  %v1605_v63 = vmul.f32 %v3588_v6, %v1401_v55 }
 0x13f   : > { %2446 = vst.msk [vmem:[%s3608_s14 + $0xa8] sm:$0xf] %vm2403_vm2, %v2965_v56  ;;  %2510 = vst.msk [vmem:[%s3608_s14 + $0x1a8] sm:$0xf] %vm2403_vm2, %v3029_v57  ;;  %v2963_v2 = vpack.c.bf16 %v1803_v58, %v1803_v58  ;;  %v3027_v3 = vpack.c.bf16 %v1867_v59, %v1867_v59  ;;  %v1546_v8 = vmul.f32 %v3943_v4, %v3176_v0  ;;  %v1806_v6 = vmax.f32 %v1678_v60, 0.0  ;;  %v1161_v32 = vpop.f32.mrf.mxu0  ;;  %v1417_v33 = vpop.f32.mrf.mxu1 }
 0x140   : > { %v1610_v5 = vmul.f32 %v3943_v4, %v3240_v1  ;;  %v1870_v7 = vmax.f32 %v1742_v61, 0.0  ;;  %v1676_v10 = vadd.f32 %v3950_v9, %v1541_v62  ;;  %v1740_v11 = vadd.f32 %v3950_v9, %v1605_v63 }
 0x141   : > { %2444 = vst.msk [vmem:[%s3608_s14 + $0xa0] sm:$0xf] %vm2403_vm2, %v2963_v2  ;;  %2508 = vst.msk [vmem:[%s3608_s14 + $0x1a0] sm:$0xf] %vm2403_vm2, %v3027_v3  ;;  %v1681_v14 = vadd.f32 %v3950_v9, %v1546_v8  ;;  %v1544_v16 = vmul.f32 %v3943_v4, %v1158_v12  ;;  %v1608_v17 = vmul.f32 %v3943_v4, %v1414_v13  ;;  %v3180_v42 = vpop.f32.mrf.mxu0  ;;  %v3244_v43 = vpop.f32.mrf.mxu1 }
 0x142   : > { %v1745_v15 = vadd.f32 %v3950_v9, %v1610_v5  ;;  %v2966_v18 = vpack.c.bf16 %v1806_v6, %v1806_v6  ;;  %v3030_v19 = vpack.c.bf16 %v1870_v7, %v1870_v7  ;;  %v1804_v20 = vmax.f32 %v1676_v10, 0.0 }
 0x143   : > { %v1868_v21 = vmax.f32 %v1740_v11, 0.0  ;;  %v1809_v24 = vmax.f32 %v1681_v14, 0.0  ;;  %v1679_v26 = vadd.f32 %v3950_v9, %v1544_v16  ;;  %v1743_v27 = vadd.f32 %v3950_v9, %v1608_v17  ;;  %v1174_v52 = vpop.f32.mrf.mxu0  ;;  %v1430_v53 = vpop.f32.mrf.mxu1 }
 0x144   : > { %v1873_v25 = vmax.f32 %v1745_v15, 0.0  ;;  %2447 = vst.msk [vmem:[%s3608_s14 + $0xac] sm:$0xf] %vm2403_vm2, %v2966_v18  ;;  %2511 = vst.msk [vmem:[%s3608_s14 + $0x1ac] sm:$0xf] %vm2403_vm2, %v3030_v19  ;;  %v2964_v28 = vpack.c.bf16 %v1804_v20, %v1804_v20  ;;  %v1547_v30 = vmul.f32 %v3943_v4, %v3177_v22  ;;  %v1611_v31 = vmul.f32 %v3943_v4, %v3241_v23 }
 0x145   : > { %v3028_v29 = vpack.c.bf16 %v1868_v21, %v1868_v21  ;;  %v2969_v34 = vpack.c.bf16 %v1809_v24, %v1809_v24  ;;  %v1807_v36 = vmax.f32 %v1679_v26, 0.0  ;;  %v1871_v37 = vmax.f32 %v1743_v27, 0.0  ;;  %v3181_v62 = vpop.f32.mrf.mxu0  ;;  %v3245_v63 = vpop.f32.mrf.mxu1 }
 0x146   : > { %v3033_v35 = vpack.c.bf16 %v1873_v25, %v1873_v25  ;;  %2445 = vst.msk [vmem:[%s3608_s14 + $0xa4] sm:$0xf] %vm2403_vm2, %v2964_v28  ;;  %v1682_v38 = vadd.f32 %v3950_v9, %v1547_v30  ;;  %v1746_v39 = vadd.f32 %v3950_v9, %v1611_v31  ;;  %v1545_v40 = vmul.f32 %v3943_v4, %v1161_v32 }
 0x147   : > { %2509 = vst.msk [vmem:[%s3608_s14 + $0x1a4] sm:$0xf] %vm2403_vm2, %v3028_v29  ;;  %v1609_v41 = vmul.f32 %v3943_v4, %v1417_v33  ;;  %2450 = vst.msk [vmem:[%s3608_s14 + $0xb8] sm:$0xf] %vm2403_vm2, %v2969_v34  ;;  %v2967_v44 = vpack.c.bf16 %v1807_v36, %v1807_v36  ;;  %v3031_v45 = vpack.c.bf16 %v1871_v37, %v1871_v37  ;;  %v1177_v10 = vpop.f32.mrf.mxu0  ;;  %v1433_v11 = vpop.f32.mrf.mxu1 }
 0x148   : > { %2514 = vst.msk [vmem:[%s3608_s14 + $0x1b8] sm:$0xf] %vm2403_vm2, %v3033_v35  ;;  %v1550_v46 = vmul.f32 %v3943_v4, %v3180_v42  ;;  %v1614_v47 = vmul.f32 %v3943_v4, %v3244_v43  ;;  %v1810_v48 = vmax.f32 %v1682_v38, 0.0  ;;  %v1874_v49 = vmax.f32 %v1746_v39, 0.0 }
 0x149   : > { %v1680_v50 = vadd.f32 %v3950_v9, %v1545_v40  ;;  %v1744_v51 = vadd.f32 %v3950_v9, %v1609_v41  ;;  %2448 = vst.msk [vmem:[%s3608_s14 + $0xb0] sm:$0xf] %vm2403_vm2, %v2967_v44  ;;  %2512 = vst.msk [vmem:[%s3608_s14 + $0x1b0] sm:$0xf] %vm2403_vm2, %v3031_v45  ;;  %v1548_v56 = vmul.f32 %v3943_v4, %v1174_v52  ;;  %v3184_v20 = vpop.f32.mrf.mxu0  ;;  %v3248_v21 = vpop.f32.mrf.mxu1 }
 0x14a   : > { %v1685_v54 = vadd.f32 %v3950_v9, %v1550_v46  ;;  %v1749_v55 = vadd.f32 %v3950_v9, %v1614_v47  ;;  %v1612_v57 = vmul.f32 %v3943_v4, %v1430_v53  ;;  %v2970_v58 = vpack.c.bf16 %v1810_v48, %v1810_v48 }
 0x14b   : > { %v3034_v59 = vpack.c.bf16 %v1874_v49, %v1874_v49  ;;  %v1808_v60 = vmax.f32 %v1680_v50, 0.0  ;;  %v1872_v61 = vmax.f32 %v1744_v51, 0.0  ;;  %v1683_v2 = vadd.f32 %v3950_v9, %v1548_v56  ;;  %v1190_v30 = vpop.f32.mrf.mxu0  ;;  %v1446_v31 = vpop.f32.mrf.mxu1 }
 0x14c   : > { %v1813_v0 = vmax.f32 %v1685_v54, 0.0  ;;  %v1877_v1 = vmax.f32 %v1749_v55, 0.0  ;;  %v1747_v3 = vadd.f32 %v3950_v9, %v1612_v57  ;;  %2451 = vst.msk [vmem:[%s3608_s14 + $0xbc] sm:$0xf] %vm2403_vm2, %v2970_v58  ;;  %v1551_v6 = vmul.f32 %v3943_v4, %v3181_v62 }
 0x14d   : > { %2515 = vst.msk [vmem:[%s3608_s14 + $0x1bc] sm:$0xf] %vm2403_vm2, %v3034_v59  ;;  %v2968_v8 = vpack.c.bf16 %v1808_v60, %v1808_v60  ;;  %v3032_v5 = vpack.c.bf16 %v1872_v61, %v1872_v61  ;;  %v1615_v7 = vmul.f32 %v3943_v4, %v3245_v63  ;;  %v1811_v14 = vmax.f32 %v1683_v2, 0.0  ;;  %v3185_v40 = vpop.f32.mrf.mxu0  ;;  %v3249_v41 = vpop.f32.mrf.mxu1 }
 0x14e   : > { %v2973_v12 = vpack.c.bf16 %v1813_v0, %v1813_v0  ;;  %v3037_v13 = vpack.c.bf16 %v1877_v1, %v1877_v1  ;;  %v1875_v15 = vmax.f32 %v1747_v3, 0.0  ;;  %v1686_v16 = vadd.f32 %v3950_v9, %v1551_v6 }
 0x14f   : > { %2449 = vst.msk [vmem:[%s3608_s14 + $0xb4] sm:$0xf] %vm2403_vm2, %v2968_v8  ;;  %2513 = vst.msk [vmem:[%s3608_s14 + $0x1b4] sm:$0xf] %vm2403_vm2, %v3032_v5  ;;  %v1750_v17 = vadd.f32 %v3950_v9, %v1615_v7  ;;  %v1549_v18 = vmul.f32 %v3943_v4, %v1177_v10  ;;  %v1613_v19 = vmul.f32 %v3943_v4, %v1433_v11  ;;  %v1193_v50 = vpop.f32.mrf.mxu0  ;;  %v1449_v51 = vpop.f32.mrf.mxu1 }
 0x150   : > { %2454 = vst.msk [vmem:[%s3608_s14 + $0xc8] sm:$0xf] %vm2403_vm2, %v2973_v12  ;;  %2518 = vst.msk [vmem:[%s3608_s14 + $0x1c8] sm:$0xf] %vm2403_vm2, %v3037_v13  ;;  %v2971_v22 = vpack.c.bf16 %v1811_v14, %v1811_v14  ;;  %v3035_v23 = vpack.c.bf16 %v1875_v15, %v1875_v15  ;;  %v1554_v24 = vmul.f32 %v3943_v4, %v3184_v20  ;;  %v1814_v26 = vmax.f32 %v1686_v16, 0.0 }
 0x151   : > { %v1618_v25 = vmul.f32 %v3943_v4, %v3248_v21  ;;  %v1878_v27 = vmax.f32 %v1750_v17, 0.0  ;;  %v1684_v28 = vadd.f32 %v3950_v9, %v1549_v18  ;;  %v1748_v29 = vadd.f32 %v3950_v9, %v1613_v19  ;;  %v3188_v60 = vpop.f32.mrf.mxu0  ;;  %v3252_v61 = vpop.f32.mrf.mxu1 }
 0x152   : > { %2452 = vst.msk [vmem:[%s3608_s14 + $0xc0] sm:$0xf] %vm2403_vm2, %v2971_v22  ;;  %2516 = vst.msk [vmem:[%s3608_s14 + $0x1c0] sm:$0xf] %vm2403_vm2, %v3035_v23  ;;  %v1689_v32 = vadd.f32 %v3950_v9, %v1554_v24  ;;  %v1552_v34 = vmul.f32 %v3943_v4, %v1190_v30  ;;  %v1616_v35 = vmul.f32 %v3943_v4, %v1446_v31 }
 0x153   : > { %v1753_v33 = vadd.f32 %v3950_v9, %v1618_v25  ;;  %v2974_v36 = vpack.c.bf16 %v1814_v26, %v1814_v26  ;;  %v3038_v37 = vpack.c.bf16 %v1878_v27, %v1878_v27  ;;  %v1812_v38 = vmax.f32 %v1684_v28, 0.0  ;;  %v1206_v6 = vpop.f32.mrf.mxu0  ;;  %v1462_v7 = vpop.f32.mrf.mxu1 }
 0x154   : > { %v1876_v39 = vmax.f32 %v1748_v29, 0.0  ;;  %v1817_v42 = vmax.f32 %v1689_v32, 0.0  ;;  %v1687_v44 = vadd.f32 %v3950_v9, %v1552_v34  ;;  %v1751_v45 = vadd.f32 %v3950_v9, %v1616_v35 }
 0x155   : > { %v1881_v43 = vmax.f32 %v1753_v33, 0.0  ;;  %2455 = vst.msk [vmem:[%s3608_s14 + $0xcc] sm:$0xf] %vm2403_vm2, %v2974_v36  ;;  %2519 = vst.msk [vmem:[%s3608_s14 + $0x1cc] sm:$0xf] %vm2403_vm2, %v3038_v37  ;;  %v2972_v46 = vpack.c.bf16 %v1812_v38, %v1812_v38  ;;  %v1555_v48 = vmul.f32 %v3943_v4, %v3185_v40  ;;  %v1619_v49 = vmul.f32 %v3943_v4, %v3249_v41  ;;  %v3189_v18 = vpop.f32.mrf.mxu0  ;;  %v3253_v19 = vpop.f32.mrf.mxu1 }
 0x156   : > { %v3036_v47 = vpack.c.bf16 %v1876_v39, %v1876_v39  ;;  %v2977_v52 = vpack.c.bf16 %v1817_v42, %v1817_v42  ;;  %v1815_v54 = vmax.f32 %v1687_v44, 0.0  ;;  %v1879_v55 = vmax.f32 %v1751_v45, 0.0 }
 0x157   : > { %v3041_v53 = vpack.c.bf16 %v1881_v43, %v1881_v43  ;;  %2453 = vst.msk [vmem:[%s3608_s14 + $0xc4] sm:$0xf] %vm2403_vm2, %v2972_v46  ;;  %v1690_v56 = vadd.f32 %v3950_v9, %v1555_v48  ;;  %v1754_v57 = vadd.f32 %v3950_v9, %v1619_v49  ;;  %v1553_v58 = vmul.f32 %v3943_v4, %v1193_v50  ;;  %v1209_v28 = vpop.f32.mrf.mxu0  ;;  %v1465_v29 = vpop.f32.mrf.mxu1 }
 0x158   : > { %2517 = vst.msk [vmem:[%s3608_s14 + $0x1c4] sm:$0xf] %vm2403_vm2, %v3036_v47  ;;  %v1617_v59 = vmul.f32 %v3943_v4, %v1449_v51  ;;  %2458 = vst.msk [vmem:[%s3608_s14 + $0xd8] sm:$0xf] %vm2403_vm2, %v2977_v52  ;;  %v2975_v62 = vpack.c.bf16 %v1815_v54, %v1815_v54  ;;  %v3039_v63 = vpack.c.bf16 %v1879_v55, %v1879_v55 }
 0x159   : > { %2522 = vst.msk [vmem:[%s3608_s14 + $0x1d8] sm:$0xf] %vm2403_vm2, %v3041_v53  ;;  %v1558_v0 = vmul.f32 %v3943_v4, %v3188_v60  ;;  %v1622_v1 = vmul.f32 %v3943_v4, %v3252_v61  ;;  %v1818_v2 = vmax.f32 %v1690_v56, 0.0  ;;  %v1882_v3 = vmax.f32 %v1754_v57, 0.0  ;;  %v3192_v38 = vpop.f32.mrf.mxu0  ;;  %v3256_v39 = vpop.f32.mrf.mxu1 }
 0x15a   : > { %v1688_v8 = vadd.f32 %v3950_v9, %v1553_v58  ;;  %v1752_v5 = vadd.f32 %v3950_v9, %v1617_v59  ;;  %2456 = vst.msk [vmem:[%s3608_s14 + $0xd0] sm:$0xf] %vm2403_vm2, %v2975_v62  ;;  %2520 = vst.msk [vmem:[%s3608_s14 + $0x1d0] sm:$0xf] %vm2403_vm2, %v3039_v63  ;;  %v1556_v12 = vmul.f32 %v3943_v4, %v1206_v6 }
 0x15b   : > { %v1693_v10 = vadd.f32 %v3950_v9, %v1558_v0  ;;  %v1757_v11 = vadd.f32 %v3950_v9, %v1622_v1  ;;  %v1620_v13 = vmul.f32 %v3943_v4, %v1462_v7  ;;  %v2978_v14 = vpack.c.bf16 %v1818_v2, %v1818_v2  ;;  %v1222_v48 = vpop.f32.mrf.mxu0  ;;  %v1478_v49 = vpop.f32.mrf.mxu1 }
 0x15c   : > { %v3042_v15 = vpack.c.bf16 %v1882_v3, %v1882_v3  ;;  %v1816_v16 = vmax.f32 %v1688_v8, 0.0  ;;  %v1880_v17 = vmax.f32 %v1752_v5, 0.0  ;;  %v1691_v22 = vadd.f32 %v3950_v9, %v1556_v12 }
 0x15d   : > { %v1821_v20 = vmax.f32 %v1693_v10, 0.0  ;;  %v1885_v21 = vmax.f32 %v1757_v11, 0.0  ;;  %v1755_v23 = vadd.f32 %v3950_v9, %v1620_v13  ;;  %2459 = vst.msk [vmem:[%s3608_s14 + $0xdc] sm:$0xf] %vm2403_vm2, %v2978_v14  ;;  %v1559_v26 = vmul.f32 %v3943_v4, %v3189_v18  ;;  %v3193_v58 = vpop.f32.mrf.mxu0  ;;  %v3257_v59 = vpop.f32.mrf.mxu1 }
 0x15e   : > { %2523 = vst.msk [vmem:[%s3608_s14 + $0x1dc] sm:$0xf] %vm2403_vm2, %v3042_v15  ;;  %v2976_v24 = vpack.c.bf16 %v1816_v16, %v1816_v16  ;;  %v3040_v25 = vpack.c.bf16 %v1880_v17, %v1880_v17  ;;  %v1623_v27 = vmul.f32 %v3943_v4, %v3253_v19  ;;  %v1819_v32 = vmax.f32 %v1691_v22, 0.0 }
 0x15f   : > { %v2981_v30 = vpack.c.bf16 %v1821_v20, %v1821_v20  ;;  %v3045_v31 = vpack.c.bf16 %v1885_v21, %v1885_v21  ;;  %v1883_v33 = vmax.f32 %v1755_v23, 0.0  ;;  %v1694_v34 = vadd.f32 %v3950_v9, %v1559_v26  ;;  %v1225_v8 = vpop.f32.mrf.mxu0  ;;  %v1481_v5 = vpop.f32.mrf.mxu1 }
 0x160   : > { %2457 = vst.msk [vmem:[%s3608_s14 + $0xd4] sm:$0xf] %vm2403_vm2, %v2976_v24  ;;  %2521 = vst.msk [vmem:[%s3608_s14 + $0x1d4] sm:$0xf] %vm2403_vm2, %v3040_v25  ;;  %v1758_v35 = vadd.f32 %v3950_v9, %v1623_v27  ;;  %v1557_v36 = vmul.f32 %v3943_v4, %v1209_v28  ;;  %v1621_v37 = vmul.f32 %v3943_v4, %v1465_v29 }
 0x161   : > { %2462 = vst.msk [vmem:[%s3608_s14 + $0xe8] sm:$0xf] %vm2403_vm2, %v2981_v30  ;;  %2526 = vst.msk [vmem:[%s3608_s14 + $0x1e8] sm:$0xf] %vm2403_vm2, %v3045_v31  ;;  %v2979_v40 = vpack.c.bf16 %v1819_v32, %v1819_v32  ;;  %v3043_v41 = vpack.c.bf16 %v1883_v33, %v1883_v33  ;;  %v1562_v42 = vmul.f32 %v3943_v4, %v3192_v38  ;;  %v1822_v44 = vmax.f32 %v1694_v34, 0.0 }
 0x162   : > { %v1626_v43 = vmul.f32 %v3943_v4, %v3256_v39  ;;  %v1886_v45 = vmax.f32 %v1758_v35, 0.0  ;;  %v1692_v46 = vadd.f32 %v3950_v9, %v1557_v36  ;;  %v1756_v47 = vadd.f32 %v3950_v9, %v1621_v37 }
 0x163   : > { %2460 = vst.msk [vmem:[%s3608_s14 + $0xe0] sm:$0xf] %vm2403_vm2, %v2979_v40  ;;  %2524 = vst.msk [vmem:[%s3608_s14 + $0x1e0] sm:$0xf] %vm2403_vm2, %v3043_v41  ;;  %v1697_v50 = vadd.f32 %v3950_v9, %v1562_v42  ;;  %v1560_v52 = vmul.f32 %v3943_v4, %v1222_v48  ;;  %v1624_v53 = vmul.f32 %v3943_v4, %v1478_v49 }
 0x164   : > { %v1761_v51 = vadd.f32 %v3950_v9, %v1626_v43  ;;  %v2982_v54 = vpack.c.bf16 %v1822_v44, %v1822_v44  ;;  %v3046_v55 = vpack.c.bf16 %v1886_v45, %v1886_v45  ;;  %v1820_v56 = vmax.f32 %v1692_v46, 0.0 }
 0x165   : > { %v1884_v57 = vmax.f32 %v1756_v47, 0.0  ;;  %v1825_v60 = vmax.f32 %v1697_v50, 0.0  ;;  %v1695_v62 = vadd.f32 %v3950_v9, %v1560_v52  ;;  %v1759_v63 = vadd.f32 %v3950_v9, %v1624_v53 }
 0x166   : > { %v1889_v61 = vmax.f32 %v1761_v51, 0.0  ;;  %2463 = vst.msk [vmem:[%s3608_s14 + $0xec] sm:$0xf] %vm2403_vm2, %v2982_v54  ;;  %2527 = vst.msk [vmem:[%s3608_s14 + $0x1ec] sm:$0xf] %vm2403_vm2, %v3046_v55  ;;  %v2980_v0 = vpack.c.bf16 %v1820_v56, %v1820_v56  ;;  %v1563_v2 = vmul.f32 %v3943_v4, %v3193_v58  ;;  %v1627_v3 = vmul.f32 %v3943_v4, %v3257_v59 }
 0x167   : > { %v3044_v1 = vpack.c.bf16 %v1884_v57, %v1884_v57  ;;  %v2985_v6 = vpack.c.bf16 %v1825_v60, %v1825_v60  ;;  %v1823_v10 = vmax.f32 %v1695_v62, 0.0  ;;  %v1887_v11 = vmax.f32 %v1759_v63, 0.0 }
 0x168   : > { %v3049_v7 = vpack.c.bf16 %v1889_v61, %v1889_v61  ;;  %2461 = vst.msk [vmem:[%s3608_s14 + $0xe4] sm:$0xf] %vm2403_vm2, %v2980_v0  ;;  %v1698_v12 = vadd.f32 %v3950_v9, %v1563_v2  ;;  %v1762_v13 = vadd.f32 %v3950_v9, %v1627_v3  ;;  %v1561_v14 = vmul.f32 %v3943_v4, %v1225_v8 }
 0x169   : > { %2525 = vst.msk [vmem:[%s3608_s14 + $0x1e4] sm:$0xf] %vm2403_vm2, %v3044_v1  ;;  %v1625_v15 = vmul.f32 %v3943_v4, %v1481_v5  ;;  %2466 = vst.msk [vmem:[%s3608_s14 + $0xf8] sm:$0xf] %vm2403_vm2, %v2985_v6  ;;  %v2983_v16 = vpack.c.bf16 %v1823_v10, %v1823_v10  ;;  %v3047_v17 = vpack.c.bf16 %v1887_v11, %v1887_v11 }
 0x16a   : > { %2530 = vst.msk [vmem:[%s3608_s14 + $0x1f8] sm:$0xf] %vm2403_vm2, %v3049_v7  ;;  %v1826_v18 = vmax.f32 %v1698_v12, 0.0  ;;  %v1890_v19 = vmax.f32 %v1762_v13, 0.0  ;;  %v1696_v20 = vadd.f32 %v3950_v9, %v1561_v14 }
 0x16b   : > { %v1760_v21 = vadd.f32 %v3950_v9, %v1625_v15  ;;  %2464 = vst.msk [vmem:[%s3608_s14 + $0xf0] sm:$0xf] %vm2403_vm2, %v2983_v16  ;;  %2528 = vst.msk [vmem:[%s3608_s14 + $0x1f0] sm:$0xf] %vm2403_vm2, %v3047_v17 }
 0x16c   : > { %v2986_v4 = vpack.c.bf16 %v1826_v18, %v1826_v18  ;;  %v3050_v22 = vpack.c.bf16 %v1890_v19, %v1890_v19  ;;  %v1824_v23 = vmax.f32 %v1696_v20, 0.0 }
 0x16d   : > { %v1888_v24 = vmax.f32 %v1760_v21, 0.0 }
 0x16e   : > { %2467 = vst.msk [vmem:[%s3608_s14 + $0xfc] sm:$0xf] %vm2403_vm2, %v2986_v4  ;;  %2531 = vst.msk [vmem:[%s3608_s14 + $0x1fc] sm:$0xf] %vm2403_vm2, %v3050_v22  ;;  %v2984_v25 = vpack.c.bf16 %v1824_v23, %v1824_v23 }
 0x16f   : > { %v3048_v26 = vpack.c.bf16 %v1888_v24, %v1888_v24 }
 0x170   : > { %2465 = vst.msk [vmem:[%s3608_s14 + $0xf4] sm:$0xf] %vm2403_vm2, %v2984_v25 }
 0x171   : > { %2529 = vst.msk [vmem:[%s3608_s14 + $0x1f4] sm:$0xf] %vm2403_vm2, %v3048_v26 }
 0x172 PF: > { %s14_s17 = sadd.s32 1, %s3387_s17   ;;  %s4138_s15 = smov %s3383_s16 }
 0x173   : > { %p11_p5 = scmp.ge.s32.totalorder %s14_s17, 4   ;;  %s4139_s16 = smov %s4141_s18 }
 0x175   :  { %13 = sbr.rel (!%p11_p5) target bundleno = 2 (0x2), region = 75 }

</bundles_post_ra>
